<compile_context>
chip_gen: v7x
topology: tpu7x:2x2x1
jax: 0.10.0
libtpu: 0.0.40
codegen_flags: <defaults>
</compile_context>

<pallas_src>
import jax
import jax.numpy as jnp
from jax import lax
from jax.experimental import pallas as pl
from jax.experimental.pallas import tpu as pltpu

EPS = 1e-5        # nn.GroupNorm default eps
GROUPS = 8        # num_groups=8 in the module


# --------------------------- fused UBlock kernel -----------------------------
def _ublock_kernel(x_ref, gnb_ref, gpool_ref, bw1_ref, bw2_ref, bskip_ref,
                   bw3_ref, ah_ref, mw_ref, o_ref):
    f32 = jnp.float32
    bf16 = jnp.bfloat16
    B, H, WC = x_ref.shape
    WCo = bw3_ref.shape[-1]

    def gn_swish(v, gamma, beta):
        # v: (B, H, W*C) f32. Per-image group stats via ONE pooled dot (s1 and
        # s2 stacked); gpool folds the group structure and the 1/(H*W*Cg).
        s1 = jnp.sum(v, axis=1)                                 # (B, W*C)
        s2 = jnp.sum(v * v, axis=1)                             # (B, W*C)
        stats = jnp.dot(jnp.concatenate([s1, s2], axis=0), gpool_ref[...],
                        preferred_element_type=f32)             # (2B, W*C)
        mean = stats[:B].reshape(B, 1, WC)
        ex2 = stats[B:].reshape(B, 1, WC)
        var = jnp.maximum(ex2 - mean * mean, 0.0)               # clamp E[x^2]-E[x]^2
        y = (v - mean) * lax.rsqrt(var + EPS) * gamma + beta
        return y * jax.nn.sigmoid(y)                            # Swish

    def conv3x3(v, bw_ref):
        # v: (B, H, W*Cin) f32 -> (B, H, W*Cout) f32.
        # dy shift + zero pad via static sublane slices (no MXU); dx shift +
        # zero pad + channel mixing folded into the banded weight. The three
        # shifted copies are lane-concatenated so the conv is ONE bf16 dot
        # with K = 3*W*Cin, accumulated in f32.
        wc = v.shape[-1]
        zrow = jnp.zeros((B, 1, wc), v.dtype)
        v_m1 = jnp.concatenate([zrow, v[:, :H - 1, :]], axis=1)  # row h <- v[h-1]
        v_p1 = jnp.concatenate([v[:, 1:, :], zrow], axis=1)      # row h <- v[h+1]
        xb = jnp.concatenate([v_m1, v, v_p1], axis=-1)           # (B, H, 3*W*Cin)
        out = jnp.dot(xb.reshape(B * H, 3 * wc).astype(bf16),
                      bw_ref[...], preferred_element_type=f32)   # (B*H, W*Cout)
        return out.reshape(B, H, bw_ref.shape[-1])

    x = x_ref[...].astype(f32)                                   # (B, H, W*Cin)
    gnb = gnb_ref[...]
    gam1, bet1 = gnb[0:1, :], gnb[1:2, :]
    gam2, bet2 = gnb[2:3, :], gnb[3:4, :]

    # ResNetBlock: conv2(swish(gn2(conv1(swish(gn1(x)))))) + skip(x)
    h = conv3x3(gn_swish(x, gam1, bet1), bw1_ref)
    h = conv3x3(gn_swish(h, gam2, bet2), bw2_ref)
    skip = jnp.dot(x.reshape(B * H, WC).astype(bf16), bskip_ref[...],
                   preferred_element_type=f32).reshape(B, H, WC)
    h = h + skip
    # UBlock conv: in -> out channels, stride 1, padding 1
    h = conv3x3(h, bw3_ref)                                      # (B, H, W*Cout)
    # Bilinear 2x upsample (align_corners=True) as two f32 matmuls; ah_ref is
    # block-diagonal over the B images so the whole tile is one store.
    z = jnp.dot(ah_ref[...], h.reshape(B * H, WCo),
                preferred_element_type=f32)                      # (B*2H, W*Cout)
    out = jnp.dot(z, mw_ref[...], preferred_element_type=f32)    # (B*2H, 2*W*Cout)
    o_ref[...] = out.reshape(B, 2 * H, mw_ref.shape[-1]).astype(o_ref.dtype)


def _ublock_pallas(x_l, prep):
    N, H, WCi = x_l.shape
    b_tile = prep["ah_big"].shape[1] // H
    assert N % b_tile == 0, (N, b_tile)
    out_w = prep["mw"].shape[1]                                  # 2*W*Cout

    def const_spec(arr):
        nd = arr.ndim
        # Grid-invariant operand. TODO(synk): add pipeline_mode=pl.Buffered(1)
        # to drop the pointless double-buffer of these constants (v7x VMEM).
        return pl.BlockSpec(arr.shape, lambda n, _nd=nd: (0,) * _nd)

    return pl.pallas_call(
        _ublock_kernel,
        out_shape=jax.ShapeDtypeStruct((N, 2 * H, out_w), jnp.float32),
        grid=(N // b_tile,),
        in_specs=[
            pl.BlockSpec((b_tile, H, WCi), lambda n: (n, 0, 0)),  # x (lane-dense)
            const_spec(prep["gnb"]),       # GN gamma/beta (tiled over W)
            const_spec(prep["gpool"]),     # GN group-pooling matrix
            const_spec(prep["bw1"]),       # conv1 banded weight (3*WCi, WCi) bf16
            const_spec(prep["bw2"]),       # conv2 banded weight (3*WCi, WCi) bf16
            const_spec(prep["bskip"]),     # 1x1 skip (block-diag, bf16)
            const_spec(prep["bw3"]),       # UBlock conv banded weight (3*WCi, WCo)
            const_spec(prep["ah_big"]),    # kron(I_b_tile, Ah) row interp (f32)
            const_spec(prep["mw"]),        # col interp kron I_Cout (f32)
        ],
        out_specs=pl.BlockSpec((b_tile, 2 * H, out_w), lambda n: (n, 0, 0)),
        compiler_params=pltpu.CompilerParams(
            dimension_semantics=("parallel",)),
    )(x_l, prep["gnb"], prep["gpool"], prep["bw1"], prep["bw2"],
      prep["bskip"], prep["bw3"], prep["ah_big"], prep["mw"])


# --------------------------- one-time weight prep ----------------------------
def _interp_matrix(n_in, n_out):
    # align_corners=True: src = i * (n_in - 1) / (n_out - 1)
    i = jnp.arange(n_out, dtype=jnp.float32)
    src = i * (n_in - 1) / (n_out - 1)
    i0 = jnp.clip(jnp.floor(src).astype(jnp.int32), 0, n_in - 2)
    w1 = src - i0.astype(jnp.float32)
    w0 = 1.0 - w1
    return (w0[:, None] * jax.nn.one_hot(i0, n_in, dtype=jnp.float32)
            + w1[:, None] * jax.nn.one_hot(i0 + 1, n_in, dtype=jnp.float32))


def _banded_conv_weight(w_oihw, W):
    """OIHW 3x3 weight -> (3*W*Cin, W*Cout) banded matrix.

    The dx shift + zero pad + channel mixing are folded into the band
    structure; the three ky blocks are stacked along K so they pair with the
    lane-concatenated [v(h-1) | v(h) | v(h+1)] activation (one MXU dot/conv).
    """
    w_hwio = jnp.transpose(w_oihw, (2, 3, 1, 0)).astype(jnp.float32)  # (3,3,I,O)
    Cin, Cout = w_hwio.shape[2], w_hwio.shape[3]
    wi = jnp.arange(W)[:, None]
    wo = jnp.arange(W)[None, :]
    dx = wi - wo + 1                                    # input col = out col + dx - 1
    valid = ((dx >= 0) & (dx <= 2)).astype(jnp.float32)
    band = w_hwio[:, jnp.clip(dx, 0, 2)]                # (3, W, W, Cin, Cout)
    band = band * valid[None, :, :, None, None]
    band = jnp.transpose(band, (0, 1, 3, 2, 4))         # (3, Win, Cin, Wout, Cout)
    return band.reshape(3 * W * Cin, W * Cout)


def prepare_params(p, H, W, b_tile):
    """Hoisted, one-time repacking of PyTorch-layout weights into kernel form."""
    f32, bf16 = jnp.float32, jnp.bfloat16
    Cin = p["gn1_w"].shape[0]
    Cout = p["conv_w"].shape[0]
    assert Cin % GROUPS == 0, "GroupNorm(num_groups=8) needs Cin % 8 == 0"
    assert H > 1 and W > 1, "align_corners bilinear upsample needs H, W > 1"
    Cg = Cin // GROUPS

    # GroupNorm affine params in (1, W*C) lane layout; rows: g1, b1, g2, b2.
    gnb = jnp.stack([jnp.tile(p["gn1_w"].astype(f32), W),
                     jnp.tile(p["gn1_b"].astype(f32), W),
                     jnp.tile(p["gn2_w"].astype(f32), W),
                     jnp.tile(p["gn2_b"].astype(f32), W)])

    # Pooling matrix: (colsum stats) @ gpool == group mean / E[x^2] broadcast.
    g_id = jnp.arange(Cin) // Cg
    same = (g_id[:, None] == g_id[None, :]).astype(f32)
    gpool = jnp.tile(same, (W, W)) / float(H * W * Cg)

    # Banded 3x3 conv weights: bf16 MXU operands, f32 accumulation in-kernel.
    bw1 = _banded_conv_weight(p["conv1_w"], W).astype(bf16)
    bw2 = _banded_conv_weight(p["conv2_w"], W).astype(bf16)
    bw3 = _banded_conv_weight(p["conv_w"], W).astype(bf16)

    # 1x1 skip as a block-diagonal (W*Cin, W*Cin) lane-dense matrix (bf16).
    wskip_io = p["skip_w"][:, :, 0, 0].T.astype(f32)            # (Cin, Cin)
    bskip = jnp.einsum("ab,ij->aibj", jnp.eye(W, dtype=f32), wskip_io)
    bskip = bskip.reshape(W * Cin, W * Cin).astype(bf16)

    # Bilinear 2x upsample (align_corners=True, matching the module): the
    # row-interp matrix is block-diagonal over the b_tile images of a grid
    # step; the col-interp matrix is a kron with I_Cout. Kept f32 (precision).
    ah = _interp_matrix(H, 2 * H)                               # (2H, H)
    ah_big = jnp.kron(jnp.eye(b_tile, dtype=f32), ah)           # (b*2H, b*H)
    aw = _interp_matrix(W, 2 * W)                               # (2W, W)
    mw = jnp.einsum("vw,cd->wcvd", aw, jnp.eye(Cout, dtype=f32))
    mw = mw.reshape(W * Cout, 2 * W * Cout)

    return dict(gnb=gnb, gpool=gpool, bw1=bw1, bw2=bw2, bskip=bskip, bw3=bw3,
                ah_big=ah_big, mw=mw)


# --------------------------------- UBlock fwd --------------------------------
@jax.jit
def ublock_forward(x_nchw, prep):
    N, Cin, H, W = x_nchw.shape
    Cout = prep["mw"].shape[0] // W
    # NCHW -> lane-dense (N, H, W*Cin); the reshape is free, the transpose is
    # the unavoidable layout change at the module boundary (see TODO above).
    x_l = jnp.transpose(x_nchw, (0, 2, 3, 1)).astype(jnp.float32)
    x_l = x_l.reshape(N, H, W * Cin)
    out = _ublock_pallas(x_l, prep)                              # (N, 2H, 2W*Cout)
    out = out.reshape(N, 2 * H, 2 * W, Cout)
    return jnp.transpose(out, (0, 3, 1, 2))                      # -> NCHW


# ----------------------------- pure-JAX reference ----------------------------
def _gn_swish_ref(x, gamma, beta):
    N, H, W, C = x.shape
    G, Cg = GROUPS, C // GROUPS
    xr = x.reshape(N, H, W, G, Cg)
    mean = xr.mean(axis=(1, 2, 4), keepdims=True)
    var = ((xr - mean) ** 2).mean(axis=(1, 2, 4), keepdims=True)
    y = ((xr - mean) / jnp.sqrt(var + EPS)).reshape(N, H, W, C) * gamma + beta
    return y * jax.nn.sigmoid(y)


def _conv_ref(x, w_oihw):
    return lax.conv_general_dilated(
        x, jnp.transpose(w_oihw, (2, 3, 1, 0)), (1, 1), [(1, 1), (1, 1)],
        dimension_numbers=("NHWC", "HWIO", "NHWC"),
        precision=lax.Precision.HIGHEST)


def ublock_forward_ref(x_nchw, p):
    x = jnp.transpose(x_nchw, (0, 2, 3, 1)).astype(jnp.float32)
    h = _gn_swish_ref(x, p["gn1_w"], p["gn1_b"])
    h = _conv_ref(h, p["conv1_w"])
    h = _gn_swish_ref(h, p["gn2_w"], p["gn2_b"])
    h = _conv_ref(h, p["conv2_w"]) + jnp.einsum(
        "nhwi,io->nhwo", x, p["skip_w"][:, :, 0, 0].T,
        precision=lax.Precision.HIGHEST)
    h = _conv_ref(h, p["conv_w"])
    _, H, W, _ = h.shape
    ah = _interp_matrix(H, 2 * H)
    aw = _interp_matrix(W, 2 * W)
    h = jnp.einsum("hH,nHWc,wW->nhwc", ah, h, aw,
                   precision=lax.Precision.HIGHEST)
    return jnp.transpose(h, (0, 3, 1, 2))


# ------------------------------------ main ------------------------------------
if __name__ == "__main__":
    # Cin divisible by 8 (GroupNorm); N chosen so grid = N / B_TILE = 2 keeps
    # both v7x TensorCores busy while each grid step batches 2 images.
    N, Cin, Cout, H, W = 4, 8, 16, 16, 16
    B_TILE = 2
    key = jax.random.PRNGKey(0)
    ks = jax.random.split(key, 9)
    x = jax.random.normal(ks[0], (N, Cin, H, W), jnp.float32)    # NCHW input

    # Deterministic synthetic parameters (PyTorch OIHW weight layout).
    params = dict(
        gn1_w=1.0 + 0.1 * jax.random.normal(ks[1], (Cin,), jnp.float32),
        gn1_b=0.1 * jax.random.normal(ks[2], (Cin,), jnp.float32),
        conv1_w=0.1 * jax.random.normal(ks[3], (Cin, Cin, 3, 3), jnp.float32),
        gn2_w=1.0 + 0.1 * jax.random.normal(ks[4], (Cin,), jnp.float32),
        gn2_b=0.1 * jax.random.normal(ks[5], (Cin,), jnp.float32),
        conv2_w=0.1 * jax.random.normal(ks[6], (Cin, Cin, 3, 3), jnp.float32),
        skip_w=0.1 * jax.random.normal(ks[7], (Cin, Cin, 1, 1), jnp.float32),
        conv_w=0.1 * jax.random.normal(ks[8], (Cout, Cin, 3, 3), jnp.float32),
    )

    prep = prepare_params(params, H, W, B_TILE)   # one-time weight repacking

    out = jax.block_until_ready(ublock_forward(x, prep))
    assert out.shape == (N, Cout, 2 * H, 2 * W), out.shape

    ref = jax.block_until_ready(ublock_forward_ref(x, params))
    abs_err = float(jnp.max(jnp.abs(out - ref)))
    rel_err = float(jnp.linalg.norm(out - ref) / jnp.linalg.norm(ref))
    # bf16 MXU operands through 3 chained convs: expect ~1e-2 max-abs and
    # sub-1% relative-Frobenius error vs the f32 reference.
    assert abs_err < 4e-2, (abs_err, rel_err)
    assert rel_err < 2e-2, (abs_err, rel_err)

    print("KERNEL_OK")
</pallas_src>

<mosaic_0001>
module attributes {stable_mosaic.version = 11 : i64} {
  func.func @_ublock_kernel(%arg0: i32, %arg1: memref<2x16x128xf32, #tpu.memory_space<vmem>>, %arg2: memref<4x128xf32, #tpu.memory_space<vmem>>, %arg3: memref<128x128xf32, #tpu.memory_space<vmem>>, %arg4: memref<384x128xbf16, #tpu.memory_space<vmem>>, %arg5: memref<384x128xbf16, #tpu.memory_space<vmem>>, %arg6: memref<128x128xbf16, #tpu.memory_space<vmem>>, %arg7: memref<384x256xbf16, #tpu.memory_space<vmem>>, %arg8: memref<64x32xf32, #tpu.memory_space<vmem>>, %arg9: memref<256x512xf32, #tpu.memory_space<vmem>>, %arg10: memref<2x32x512xf32, #tpu.memory_space<vmem>>) attributes {dimension_semantics = [#tpu.dimension_semantics<parallel>], iteration_bounds = array<i64: 2>, scalar_prefetch = 0 : i64, scratch_operands = 0 : i64, tpu.core_type = #tpu.core_type<tc>, window_params = [{transform_indices = @transform_0, window_bounds = array<i64: 2, 16, 128>}, {pipeline_mode = #tpu.pipeline_mode<synchronous>, transform_indices = @transform_1, window_bounds = array<i64: 4, 128>}, {pipeline_mode = #tpu.pipeline_mode<synchronous>, transform_indices = @transform_2, window_bounds = array<i64: 128, 128>}, {pipeline_mode = #tpu.pipeline_mode<synchronous>, transform_indices = @transform_3, window_bounds = array<i64: 384, 128>}, {pipeline_mode = #tpu.pipeline_mode<synchronous>, transform_indices = @transform_4, window_bounds = array<i64: 384, 128>}, {pipeline_mode = #tpu.pipeline_mode<synchronous>, transform_indices = @transform_5, window_bounds = array<i64: 128, 128>}, {pipeline_mode = #tpu.pipeline_mode<synchronous>, transform_indices = @transform_6, window_bounds = array<i64: 384, 256>}, {pipeline_mode = #tpu.pipeline_mode<synchronous>, transform_indices = @transform_7, window_bounds = array<i64: 64, 32>}, {pipeline_mode = #tpu.pipeline_mode<synchronous>, transform_indices = @transform_8, window_bounds = array<i64: 256, 512>}, {transform_indices = @transform_9, window_bounds = array<i64: 2, 32, 512>}]} {
    %c0 = arith.constant 0 : index
    %c0_0 = arith.constant 0 : index
    %c0_1 = arith.constant 0 : index
    %0 = vector.load %arg1[%c0, %c0_0, %c0_1] : memref<2x16x128xf32, #tpu.memory_space<vmem>>, vector<2x16x128xf32>
    %c0_2 = arith.constant 0 : index
    %c0_3 = arith.constant 0 : index
    %1 = vector.load %arg2[%c0_2, %c0_3] : memref<4x128xf32, #tpu.memory_space<vmem>>, vector<4x128xf32>
    %2 = vector.extract_strided_slice %1 {offsets = [0, 0], sizes = [1, 128], strides = [1, 1]} : vector<4x128xf32> to vector<1x128xf32>
    %3 = vector.extract_strided_slice %1 {offsets = [1, 0], sizes = [1, 128], strides = [1, 1]} : vector<4x128xf32> to vector<1x128xf32>
    %4 = vector.extract_strided_slice %1 {offsets = [2, 0], sizes = [1, 128], strides = [1, 1]} : vector<4x128xf32> to vector<1x128xf32>
    %5 = vector.extract_strided_slice %1 {offsets = [3, 0], sizes = [1, 128], strides = [1, 1]} : vector<4x128xf32> to vector<1x128xf32>
    %cst = arith.constant dense<0.000000e+00> : vector<2x128xf32>
    %6 = vector.multi_reduction <add>, %0, %cst [1] : vector<2x16x128xf32> to vector<2x128xf32>
    %7 = arith.mulf %0, %0 : vector<2x16x128xf32>
    %cst_4 = arith.constant dense<0.000000e+00> : vector<2x128xf32>
    %8 = vector.multi_reduction <add>, %7, %cst_4 [1] : vector<2x16x128xf32> to vector<2x128xf32>
    %9 = tpu.concatenate %6, %8 in 0 : vector<2x128xf32>, vector<2x128xf32> -> vector<4x128xf32>
    %c0_5 = arith.constant 0 : index
    %c0_6 = arith.constant 0 : index
    %10 = vector.load %arg3[%c0_5, %c0_6] : memref<128x128xf32, #tpu.memory_space<vmem>>, vector<128x128xf32>
    %cst_7 = arith.constant dense<0.000000e+00> : vector<4x128xf32>
    %11 = tpu.matmul %9, %10, %cst_7 {dimension_numbers = #tpu.dot_dimension_numbers<[1], [0], [0], [1], [0, 0, 1, 1], [], []>} : vector<4x128xf32>, vector<128x128xf32>, vector<4x128xf32> -> vector<4x128xf32>
    %12 = vector.extract_strided_slice %11 {offsets = [0, 0], sizes = [2, 128], strides = [1, 1]} : vector<4x128xf32> to vector<2x128xf32>
    %13 = vector.shape_cast %12 : vector<2x128xf32> to vector<2x1x128xf32>
    %14 = vector.extract_strided_slice %11 {offsets = [2, 0], sizes = [2, 128], strides = [1, 1]} : vector<4x128xf32> to vector<2x128xf32>
    %15 = vector.shape_cast %14 : vector<2x128xf32> to vector<2x1x128xf32>
    %16 = arith.mulf %13, %13 : vector<2x1x128xf32>
    %17 = arith.subf %15, %16 : vector<2x1x128xf32>
    %cst_8 = arith.constant 0.000000e+00 : f32
    %18 = vector.broadcast %cst_8 : f32 to vector<2x1x128xf32>
    %19 = arith.maximumf %17, %18 : vector<2x1x128xf32>
    %20 = vector.broadcast %13 : vector<2x1x128xf32> to vector<2x16x128xf32>
    %21 = arith.subf %0, %20 : vector<2x16x128xf32>
    %cst_9 = arith.constant 9.99999974E-6 : f32
    %22 = vector.broadcast %cst_9 : f32 to vector<2x1x128xf32>
    %23 = arith.addf %19, %22 : vector<2x1x128xf32>
    %24 = math.rsqrt %23 : vector<2x1x128xf32>
    %25 = vector.broadcast %24 : vector<2x1x128xf32> to vector<2x16x128xf32>
    %26 = arith.mulf %21, %25 : vector<2x16x128xf32>
    %27 = vector.shape_cast %2 : vector<1x128xf32> to vector<1x1x128xf32>
    %28 = vector.broadcast %27 : vector<1x1x128xf32> to vector<2x16x128xf32>
    %29 = arith.mulf %26, %28 : vector<2x16x128xf32>
    %30 = vector.shape_cast %3 : vector<1x128xf32> to vector<1x1x128xf32>
    %31 = vector.broadcast %30 : vector<1x1x128xf32> to vector<2x16x128xf32>
    %32 = arith.addf %29, %31 : vector<2x16x128xf32>
    %33 = arith.negf %32 : vector<2x16x128xf32>
    %34 = math.exp %33 : vector<2x16x128xf32>
    %cst_10 = arith.constant 1.000000e+00 : f32
    %35 = vector.broadcast %cst_10 : f32 to vector<2x16x128xf32>
    %36 = arith.addf %35, %34 : vector<2x16x128xf32>
    %37 = arith.divf %35, %36 : vector<2x16x128xf32>
    %38 = arith.mulf %32, %37 : vector<2x16x128xf32>
    %cst_11 = arith.constant 0.000000e+00 : f32
    %39 = vector.broadcast %cst_11 : f32 to vector<2x1x128xf32>
    %40 = vector.extract_strided_slice %38 {offsets = [0, 0, 0], sizes = [2, 15, 128], strides = [1, 1, 1]} : vector<2x16x128xf32> to vector<2x15x128xf32>
    %41 = tpu.concatenate %39, %40 in 1 : vector<2x1x128xf32>, vector<2x15x128xf32> -> vector<2x16x128xf32>
    %42 = vector.extract_strided_slice %38 {offsets = [0, 1, 0], sizes = [2, 15, 128], strides = [1, 1, 1]} : vector<2x16x128xf32> to vector<2x15x128xf32>
    %43 = tpu.concatenate %42, %39 in 1 : vector<2x15x128xf32>, vector<2x1x128xf32> -> vector<2x16x128xf32>
    %44 = tpu.concatenate %41, %38, %43 in 2 : vector<2x16x128xf32>, vector<2x16x128xf32>, vector<2x16x128xf32> -> vector<2x16x384xf32>
    %45 = vector.shape_cast %44 : vector<2x16x384xf32> to vector<32x384xf32>
    %46 = arith.truncf %45 : vector<32x384xf32> to vector<32x384xbf16>
    %c0_12 = arith.constant 0 : index
    %c0_13 = arith.constant 0 : index
    %47 = vector.load %arg4[%c0_12, %c0_13] : memref<384x128xbf16, #tpu.memory_space<vmem>>, vector<384x128xbf16>
    %cst_14 = arith.constant dense<0.000000e+00> : vector<32x128xf32>
    %48 = tpu.matmul %46, %47, %cst_14 {dimension_numbers = #tpu.dot_dimension_numbers<[1], [0], [0], [1], [0, 0, 1, 1], [], []>} : vector<32x384xbf16>, vector<384x128xbf16>, vector<32x128xf32> -> vector<32x128xf32>
    %49 = vector.shape_cast %48 : vector<32x128xf32> to vector<2x16x128xf32>
    %cst_15 = arith.constant dense<0.000000e+00> : vector<2x128xf32>
    %50 = vector.multi_reduction <add>, %49, %cst_15 [1] : vector<2x16x128xf32> to vector<2x128xf32>
    %51 = arith.mulf %49, %49 : vector<2x16x128xf32>
    %cst_16 = arith.constant dense<0.000000e+00> : vector<2x128xf32>
    %52 = vector.multi_reduction <add>, %51, %cst_16 [1] : vector<2x16x128xf32> to vector<2x128xf32>
    %53 = tpu.concatenate %50, %52 in 0 : vector<2x128xf32>, vector<2x128xf32> -> vector<4x128xf32>
    %c0_17 = arith.constant 0 : index
    %c0_18 = arith.constant 0 : index
    %54 = vector.load %arg3[%c0_17, %c0_18] : memref<128x128xf32, #tpu.memory_space<vmem>>, vector<128x128xf32>
    %cst_19 = arith.constant dense<0.000000e+00> : vector<4x128xf32>
    %55 = tpu.matmul %53, %54, %cst_19 {dimension_numbers = #tpu.dot_dimension_numbers<[1], [0], [0], [1], [0, 0, 1, 1], [], []>} : vector<4x128xf32>, vector<128x128xf32>, vector<4x128xf32> -> vector<4x128xf32>
    %56 = vector.extract_strided_slice %55 {offsets = [0, 0], sizes = [2, 128], strides = [1, 1]} : vector<4x128xf32> to vector<2x128xf32>
    %57 = vector.shape_cast %56 : vector<2x128xf32> to vector<2x1x128xf32>
    %58 = vector.extract_strided_slice %55 {offsets = [2, 0], sizes = [2, 128], strides = [1, 1]} : vector<4x128xf32> to vector<2x128xf32>
    %59 = vector.shape_cast %58 : vector<2x128xf32> to vector<2x1x128xf32>
    %60 = arith.mulf %57, %57 : vector<2x1x128xf32>
    %61 = arith.subf %59, %60 : vector<2x1x128xf32>
    %cst_20 = arith.constant 0.000000e+00 : f32
    %62 = vector.broadcast %cst_20 : f32 to vector<2x1x128xf32>
    %63 = arith.maximumf %61, %62 : vector<2x1x128xf32>
    %64 = vector.broadcast %57 : vector<2x1x128xf32> to vector<2x16x128xf32>
    %65 = arith.subf %49, %64 : vector<2x16x128xf32>
    %cst_21 = arith.constant 9.99999974E-6 : f32
    %66 = vector.broadcast %cst_21 : f32 to vector<2x1x128xf32>
    %67 = arith.addf %63, %66 : vector<2x1x128xf32>
    %68 = math.rsqrt %67 : vector<2x1x128xf32>
    %69 = vector.broadcast %68 : vector<2x1x128xf32> to vector<2x16x128xf32>
    %70 = arith.mulf %65, %69 : vector<2x16x128xf32>
    %71 = vector.shape_cast %4 : vector<1x128xf32> to vector<1x1x128xf32>
    %72 = vector.broadcast %71 : vector<1x1x128xf32> to vector<2x16x128xf32>
    %73 = arith.mulf %70, %72 : vector<2x16x128xf32>
    %74 = vector.shape_cast %5 : vector<1x128xf32> to vector<1x1x128xf32>
    %75 = vector.broadcast %74 : vector<1x1x128xf32> to vector<2x16x128xf32>
    %76 = arith.addf %73, %75 : vector<2x16x128xf32>
    %77 = arith.negf %76 : vector<2x16x128xf32>
    %78 = math.exp %77 : vector<2x16x128xf32>
    %cst_22 = arith.constant 1.000000e+00 : f32
    %79 = vector.broadcast %cst_22 : f32 to vector<2x16x128xf32>
    %80 = arith.addf %79, %78 : vector<2x16x128xf32>
    %81 = arith.divf %79, %80 : vector<2x16x128xf32>
    %82 = arith.mulf %76, %81 : vector<2x16x128xf32>
    %cst_23 = arith.constant 0.000000e+00 : f32
    %83 = vector.broadcast %cst_23 : f32 to vector<2x1x128xf32>
    %84 = vector.extract_strided_slice %82 {offsets = [0, 0, 0], sizes = [2, 15, 128], strides = [1, 1, 1]} : vector<2x16x128xf32> to vector<2x15x128xf32>
    %85 = tpu.concatenate %83, %84 in 1 : vector<2x1x128xf32>, vector<2x15x128xf32> -> vector<2x16x128xf32>
    %86 = vector.extract_strided_slice %82 {offsets = [0, 1, 0], sizes = [2, 15, 128], strides = [1, 1, 1]} : vector<2x16x128xf32> to vector<2x15x128xf32>
    %87 = tpu.concatenate %86, %83 in 1 : vector<2x15x128xf32>, vector<2x1x128xf32> -> vector<2x16x128xf32>
    %88 = tpu.concatenate %85, %82, %87 in 2 : vector<2x16x128xf32>, vector<2x16x128xf32>, vector<2x16x128xf32> -> vector<2x16x384xf32>
    %89 = vector.shape_cast %88 : vector<2x16x384xf32> to vector<32x384xf32>
    %90 = arith.truncf %89 : vector<32x384xf32> to vector<32x384xbf16>
    %c0_24 = arith.constant 0 : index
    %c0_25 = arith.constant 0 : index
    %91 = vector.load %arg5[%c0_24, %c0_25] : memref<384x128xbf16, #tpu.memory_space<vmem>>, vector<384x128xbf16>
    %cst_26 = arith.constant dense<0.000000e+00> : vector<32x128xf32>
    %92 = tpu.matmul %90, %91, %cst_26 {dimension_numbers = #tpu.dot_dimension_numbers<[1], [0], [0], [1], [0, 0, 1, 1], [], []>} : vector<32x384xbf16>, vector<384x128xbf16>, vector<32x128xf32> -> vector<32x128xf32>
    %93 = vector.shape_cast %92 : vector<32x128xf32> to vector<2x16x128xf32>
    %94 = vector.shape_cast %0 : vector<2x16x128xf32> to vector<32x128xf32>
    %95 = arith.truncf %94 : vector<32x128xf32> to vector<32x128xbf16>
    %c0_27 = arith.constant 0 : index
    %c0_28 = arith.constant 0 : index
    %96 = vector.load %arg6[%c0_27, %c0_28] : memref<128x128xbf16, #tpu.memory_space<vmem>>, vector<128x128xbf16>
    %cst_29 = arith.constant dense<0.000000e+00> : vector<32x128xf32>
    %97 = tpu.matmul %95, %96, %cst_29 {dimension_numbers = #tpu.dot_dimension_numbers<[1], [0], [0], [1], [0, 0, 1, 1], [], []>} : vector<32x128xbf16>, vector<128x128xbf16>, vector<32x128xf32> -> vector<32x128xf32>
    %98 = vector.shape_cast %97 : vector<32x128xf32> to vector<2x16x128xf32>
    %99 = arith.addf %93, %98 : vector<2x16x128xf32>
    %cst_30 = arith.constant 0.000000e+00 : f32
    %100 = vector.broadcast %cst_30 : f32 to vector<2x1x128xf32>
    %101 = vector.extract_strided_slice %99 {offsets = [0, 0, 0], sizes = [2, 15, 128], strides = [1, 1, 1]} : vector<2x16x128xf32> to vector<2x15x128xf32>
    %102 = tpu.concatenate %100, %101 in 1 : vector<2x1x128xf32>, vector<2x15x128xf32> -> vector<2x16x128xf32>
    %103 = vector.extract_strided_slice %99 {offsets = [0, 1, 0], sizes = [2, 15, 128], strides = [1, 1, 1]} : vector<2x16x128xf32> to vector<2x15x128xf32>
    %104 = tpu.concatenate %103, %100 in 1 : vector<2x15x128xf32>, vector<2x1x128xf32> -> vector<2x16x128xf32>
    %105 = tpu.concatenate %102, %99, %104 in 2 : vector<2x16x128xf32>, vector<2x16x128xf32>, vector<2x16x128xf32> -> vector<2x16x384xf32>
    %106 = vector.shape_cast %105 : vector<2x16x384xf32> to vector<32x384xf32>
    %107 = arith.truncf %106 : vector<32x384xf32> to vector<32x384xbf16>
    %c0_31 = arith.constant 0 : index
    %c0_32 = arith.constant 0 : index
    %108 = vector.load %arg7[%c0_31, %c0_32] : memref<384x256xbf16, #tpu.memory_space<vmem>>, vector<384x256xbf16>
    %cst_33 = arith.constant dense<0.000000e+00> : vector<32x256xf32>
    %109 = tpu.matmul %107, %108, %cst_33 {dimension_numbers = #tpu.dot_dimension_numbers<[1], [0], [0], [1], [0, 0, 1, 1], [], []>} : vector<32x384xbf16>, vector<384x256xbf16>, vector<32x256xf32> -> vector<32x256xf32>
    %110 = vector.shape_cast %109 : vector<32x256xf32> to vector<2x16x256xf32>
    %c0_34 = arith.constant 0 : index
    %c0_35 = arith.constant 0 : index
    %111 = vector.load %arg8[%c0_34, %c0_35] : memref<64x32xf32, #tpu.memory_space<vmem>>, vector<64x32xf32>
    %112 = vector.shape_cast %110 : vector<2x16x256xf32> to vector<32x256xf32>
    %cst_36 = arith.constant dense<0.000000e+00> : vector<64x256xf32>
    %113 = tpu.matmul %111, %112, %cst_36 {dimension_numbers = #tpu.dot_dimension_numbers<[1], [0], [0], [1], [0, 0, 1, 1], [], []>} : vector<64x32xf32>, vector<32x256xf32>, vector<64x256xf32> -> vector<64x256xf32>
    %c0_37 = arith.constant 0 : index
    %c0_38 = arith.constant 0 : index
    %114 = vector.load %arg9[%c0_37, %c0_38] : memref<256x512xf32, #tpu.memory_space<vmem>>, vector<256x512xf32>
    %cst_39 = arith.constant dense<0.000000e+00> : vector<64x512xf32>
    %115 = tpu.matmul %113, %114, %cst_39 {dimension_numbers = #tpu.dot_dimension_numbers<[1], [0], [0], [1], [0, 0, 1, 1], [], []>} : vector<64x256xf32>, vector<256x512xf32>, vector<64x512xf32> -> vector<64x512xf32>
    %116 = vector.shape_cast %115 : vector<64x512xf32> to vector<2x32x512xf32>
    %c0_40 = arith.constant 0 : index
    %c0_41 = arith.constant 0 : index
    %c0_42 = arith.constant 0 : index
    %117 = vector.load %arg10[%c0_40, %c0_41, %c0_42] : memref<2x32x512xf32, #tpu.memory_space<vmem>>, vector<2x32x512xf32>
    tpu.vector_store %arg10[%c0_40, %c0_41, %c0_42], %116 {strides = array<i32>} : memref<2x32x512xf32, #tpu.memory_space<vmem>>, vector<2x32x512xf32>,
    return
  }
  func.func @transform_0(%arg0: i32) -> (i32, i32, i32) {
    %c0_i32 = arith.constant 0 : i32
    %c0_i32_0 = arith.constant 0 : i32
    %c0_i32_1 = arith.constant 0 : i32
    return %arg0, %c0_i32, %c0_i32_0 : i32, i32, i32
  }
  func.func @transform_1(%arg0: i32) -> (i32, i32) {
    %c0_i32 = arith.constant 0 : i32
    %c0_i32_0 = arith.constant 0 : i32
    %c0_i32_1 = arith.constant 0 : i32
    return %c0_i32, %c0_i32_0 : i32, i32
  }
  func.func @transform_2(%arg0: i32) -> (i32, i32) {
    %c0_i32 = arith.constant 0 : i32
    %c0_i32_0 = arith.constant 0 : i32
    %c0_i32_1 = arith.constant 0 : i32
    return %c0_i32, %c0_i32_0 : i32, i32
  }
  func.func @transform_3(%arg0: i32) -> (i32, i32) {
    %c0_i32 = arith.constant 0 : i32
    %c0_i32_0 = arith.constant 0 : i32
    %c0_i32_1 = arith.constant 0 : i32
    return %c0_i32, %c0_i32_0 : i32, i32
  }
  func.func @transform_4(%arg0: i32) -> (i32, i32) {
    %c0_i32 = arith.constant 0 : i32
    %c0_i32_0 = arith.constant 0 : i32
    %c0_i32_1 = arith.constant 0 : i32
    return %c0_i32, %c0_i32_0 : i32, i32
  }
  func.func @transform_5(%arg0: i32) -> (i32, i32) {
    %c0_i32 = arith.constant 0 : i32
    %c0_i32_0 = arith.constant 0 : i32
    %c0_i32_1 = arith.constant 0 : i32
    return %c0_i32, %c0_i32_0 : i32, i32
  }
  func.func @transform_6(%arg0: i32) -> (i32, i32) {
    %c0_i32 = arith.constant 0 : i32
    %c0_i32_0 = arith.constant 0 : i32
    %c0_i32_1 = arith.constant 0 : i32
    return %c0_i32, %c0_i32_0 : i32, i32
  }
  func.func @transform_7(%arg0: i32) -> (i32, i32) {
    %c0_i32 = arith.constant 0 : i32
    %c0_i32_0 = arith.constant 0 : i32
    %c0_i32_1 = arith.constant 0 : i32
    return %c0_i32, %c0_i32_0 : i32, i32
  }
  func.func @transform_8(%arg0: i32) -> (i32, i32) {
    %c0_i32 = arith.constant 0 : i32
    %c0_i32_0 = arith.constant 0 : i32
    %c0_i32_1 = arith.constant 0 : i32
    return %c0_i32, %c0_i32_0 : i32, i32
  }
  func.func @transform_9(%arg0: i32) -> (i32, i32, i32) {
    %c0_i32 = arith.constant 0 : i32
    %c0_i32_0 = arith.constant 0 : i32
    %c0_i32_1 = arith.constant 0 : i32
    return %arg0, %c0_i32, %c0_i32_0 : i32, i32, i32
  }
}

</mosaic_0001>

<bundles_post_ra>
// kernel: ublock_forward.1
= control target key start
LH: loop header
LB: loop body
LE: loop exit
PB: predicated region body
PF: predicated region fallthrough
CT: control target
= control target key end

     0   :  { %14 = vsyncpa [#allocation3], 0  ;;  %s4648_s0 = inlined_call_operand.vmem [shape: f32[4,16,128], index: 0, kind: input, shape index: {}]   ;;  %s4649_s1 = inlined_call_operand.vmem [shape: f32[4,128], index: 1, kind: input, shape index: {}]   ;;  %s4650_s2 = inlined_call_operand.vmem [shape: f32[128,128], index: 2, kind: input, shape index: {}]   ;;  %s4651_s3 = inlined_call_operand.vmem [shape: bf16[384,128], index: 3, kind: input, shape index: {}]   ;;  %s4652_s4 = inlined_call_operand.hbm [shape: bf16[384,128], index: 4, kind: input, shape index: {}]   ;;  %s4653_s5 = inlined_call_operand.hbm [shape: bf16[128,128], index: 5, kind: input, shape index: {}]   ;;  %s4654_s6 = inlined_call_operand.vmem [shape: bf16[384,256], index: 6, kind: input, shape index: {}]   ;;  %s4655_s7 = inlined_call_operand.vmem [shape: f32[64,32], index: 7, kind: input, shape index: {}]   ;;  %s4656_s8 = inlined_call_operand.vmem [shape: f32[256,512], index: 8, kind: input, shape index: {}]   ;;  %s4657_s9 = inlined_call_operand.vmem [shape: f32[4,32,512], index: 9, kind: output, shape index: {}]  }
   0x1   :  { %15 = vsyncpa [#allocation5], 0  ;;  %s3625_s30 = smov 0  }
   0x2 LB: > { %s2653_s10 = sadd.s32 4294967295, %s3563_s30   ;;  %p2655_p0 = scmp.ge.s32.totalorder %s3563_s30, 1  ;;  %s3563_s30 = sphi %s3625_s30, %s21_s30  }
   0x3   : > { %p246_p1 = scmp.lt.s32.totalorder %s3563_s30, 3  ;;  %s3565_s11 = smov [#allocation2]  }
   0x4   : > { %s267_s12 = sshll.u32 %s3565_s11, 4  ;;  %p3639_p3 = scmp.eq.s32.totalorder %s2653_s10, 0  ;;  %s268_s12 = int_to_ptr.vmem [resolvable:$true] %s267_s12 }
   0x5   : > { %p3633_p2 = pnand %p2655_p0, %p246_p1  ;;  %s3566_s15 = smov [#allocation4]  }
   0x6   : > { %s4662_s14 = scalar_select %p3639_p3, 1, 0 }
   0x7   : > { %s4661_s13 = scalar_select %p3633_p2, 1, 0 }
   0x8   : > { %p3292_p4 = pneg %p3633_p2  ;;  %s280_s16 = sshll.u32 %s3566_s15, 4  ;;  %s3651_s16 = int_to_ptr.vmem [resolvable:$true] %s280_s16 }
   0x9   : > { %s3493_s20 = scalar_lea.hbm %s4652_s4, 3072 }
   0xa   : > { %p3647_p5 = pnand %p3639_p3, %p3292_p4  ;;  %p3494_p6 = scmp.ne.s32.totalorder %s4652_s4, %s3493_s20 }
   0xb   : > { %p3500_p10 = scmp.lt.u32.totalorder %s3493_s20, %s4652_s4 }
   0xc   : > { %p3495_p7 = pneg %p3647_p5 }
   0xe   : > { %p3496_p8 = pnand %p3495_p7, %p3494_p6 }
  0x10   : > { %p3497_p9 = pneg %p3496_p8 }
  0x12   : > { %p3502_p11 = pnand %p3500_p10, %p3497_p9 }
  0x14   : > { %3505 = shalt.err (!%p3502_p11)
}
  0x15   : > { %s3506_s25 = scalar_lea.vmem %s268_s12, 3072  ;;  %p3514_p1 = scmp.lt.s32.totalorder %s268_s12, %s268_s12 }
  0x16   : > { %p3507_p12 = scmp.ne.s32.totalorder %s268_s12, %s3506_s25  ;;  %p3515_p4 = scmp.lt.s32.totalorder %s3506_s25, %s3506_s25 }
  0x18   : > { %p3509_p13 = pnand %p3507_p12, %p3495_p7  ;;  %p3516_p3 = por %p3515_p4, %p3514_p1 }
  0x1a   : > { %p3510_p0 = pneg %p3509_p13 }
  0x1c   : > { %p3517_p2 = pnand %p3516_p3, %p3510_p0 }
  0x1e   : > { %3520 = shalt.err (!%p3517_p2)
}
  0x1f   : > { %s3567_s26 = smov 64   ;;  %s3568_s27 = smov 4  }
  0x20   : > { %3295 = dma.hbm_to_vmem [thread:$0]  (!%p3647_p5), %s4652_s4, 3072, %s268_s12, [#allocation3], %s3567_s26, %s3567_s26, %s3568_s27  }
  0x21   : > { %s3521_s18 = scalar_lea.hbm %s4653_s5, 1024 }
  0x22   : > { %p3522_p6 = scmp.ne.s32.totalorder %s4653_s5, %s3521_s18  ;;  %p3528_p8 = scmp.lt.u32.totalorder %s3521_s18, %s4653_s5 }
  0x24   : > { %p3524_p2 = pnand %p3522_p6, %p3495_p7 }
  0x26   : > { %p3525_p3 = pneg %p3524_p2 }
  0x28   : > { %p3530_p9 = pnand %p3528_p8, %p3525_p3 }
  0x2a   : > { %3533 = shalt.err (!%p3530_p9)
}
  0x2b   : > { %s3534_s12 = scalar_lea.vmem %s3651_s16, 1024  ;;  %p3542_p13 = scmp.lt.s32.totalorder %s3651_s16, %s3651_s16 }
  0x2c   : > { %p3535_p10 = scmp.ne.s32.totalorder %s3651_s16, %s3534_s12  ;;  %p3543_p0 = scmp.lt.s32.totalorder %s3534_s12, %s3534_s12 }
  0x2e   : > { %p3537_p11 = pnand %p3535_p10, %p3495_p7  ;;  %p3544_p1 = por %p3543_p0, %p3542_p13 }
  0x30   : > { %p3538_p12 = pneg %p3537_p11 }
  0x32   : > { %p3545_p4 = pnand %p3544_p1, %p3538_p12 }
  0x34   : > { %3548 = shalt.err (!%p3545_p4)
}
  0x35   : > { %3298 = dma.hbm_to_vmem [thread:$0]  (!%p3647_p5), %s4653_s5, 1024, %s3651_s16, [#allocation5], %s3567_s26, %s3567_s26, %s3568_s27  }
  0x36   : > { %p4664_p6 = scmp.ne.s32.totalorder %s4661_s13, 0 }
  0x37   : > { %p4665_p2 = scmp.ne.s32.totalorder (!%p4664_p6), %s4662_s14, 0 }
  0x38   : > { %315 = sbr.rel (%p4664_p6) target bundleno = 1873 (0x751), region = 56 }
  0x3f   : > { %3554 = dma.done.wait (%p4665_p2), [#allocation3], 3072  }
  0x40   : > { %3556 = vsyncadd (%p4665_p2), [#allocation3], 4294964224 }
  0x41   : > { %3558 = dma.done.wait (%p4665_p2), [#allocation5], 1024  }
  0x42   : > { %3560 = vsyncadd (%p4665_p2), [#allocation5], 4294966272  ;;  %s2662_s17 = sshll.u32 %s2653_s10, 1  ;;  %v3569_v0 = vmov 0.0|0.0   ;;  %vm3570_vm0 = vmmov 0   ;;  %v3571_v1 = vmov 0.0  }
  0x43   : > { %3084 = vmatprep.subr.bf16.mxu1 %v3569_v0  ;;  %2986 = vmatprep.mubr.msk.f32.mxu1 %vm3570_vm0, %v3571_v1  ;;  %p358_p5 = scmp.lt.s32.totalorder %s2662_s17, 3  ;;  %v421_v2 = vld [vmem:[%s4650_s2] sm:$0xff]  ;;  %v422_v3 = vld [vmem:[%s4650_s2 + $0x8] sm:$0xff]  ;;  %v423_v4 = vld [vmem:[%s4650_s2 + $0x10] sm:$0xff]  ;;  %vm411_vm1 = vcmask 1041409   ;;  %vm416_vm2 = vcmask 1043459  }
  0x44   : > { %v3727_v5 = vpack.c.bf16 %v422_v3, %v421_v2  ;;  %v424_v6 = vld [vmem:[%s4650_s2 + $0x18] sm:$0xff]  ;;  %v425_v8 = vld [vmem:[%s4650_s2 + $0x20] sm:$0xff]  ;;  %v426_v9 = vld [vmem:[%s4650_s2 + $0x28] sm:$0xff]  ;;  %vm419_vm3 = vcmask 1041408   ;;  %vm624_vm4 = vcmask 1040384   ;;  %vm637_vm6 = vcmask 1046528  }
  0x45   : > { %s4671_s17 = smov (!%p358_p5, %s2662_s17), 3  ;;  %v3738_v7 = vpack.c.bf16 %v424_v6, %v423_v4  ;;  %v427_v12 = vld [vmem:[%s4650_s2 + $0x30] sm:$0xff]  ;;  %v428_v13 = vld [vmem:[%s4650_s2 + $0x38] sm:$0xff]  ;;  %v3772_v19 = vpack.c.bf16 %v426_v9, %v425_v8  ;;  %v429_v27 = vld [vmem:[%s4650_s2 + $0x40] sm:$0xff]  ;;  %vm3573_vm7 = vmmov 1   ;;  %vm2049_vm10 = vcmask 261120  }
  0x46   : > { %s2832_s13 = sshll.u32 %s4671_s17, 4  ;;  %3086 = vmatpush3.bf16.msra.mxu1 %v3727_v5  ;;  %v430_v28 = vld [vmem:[%s4650_s2 + $0x48] sm:$0xff]  ;;  %v3788_v31 = vpack.c.bf16 %v428_v13, %v427_v12  ;;  %v431_v38 = vld [vmem:[%s4650_s2 + $0x50] sm:$0xff]  ;;  %v432_v39 = vld [vmem:[%s4650_s2 + $0x58] sm:$0xff]  ;;  %s2833_s14 = sshll.u32 %s4671_s17, 7 }
  0x47   : > { %s3735_s18 = scalar_lea.vmem %s4648_s0, %s2832_s13  ;;  %3087 = vmatprep.subr.bf16.mxu1 %v3569_v0  ;;  %v3798_v42 = vpack.c.bf16 %v430_v28, %v429_v27  ;;  %v433_v49 = vld [vmem:[%s4650_s2 + $0x60] sm:$0xff]  ;;  %v434_v50 = vld [vmem:[%s4650_s2 + $0x68] sm:$0xff]  ;;  %v3808_v52 = vpack.c.bf16 %v432_v39, %v431_v38  ;;  %v435_v54 = vld [vmem:[%s4650_s2 + $0x70] sm:$0xff]  ;;  %s4611_s27 = scalar_lea.vmem %s4657_s9, %s2833_s14 }
  0x48   : > { %v3748_v10 = vld [vmem:[%s3735_s18] sm:$0xff]  ;;  %v3751_v11 = vld [vmem:[%s3735_s18 + $0x8] sm:$0xff]  ;;  %v3760_v14 = vld [vmem:[%s3735_s18 + $0x10] sm:$0xff]  ;;  %v3818_v56 = vpack.c.bf16 %v434_v50, %v433_v49 }
  0x49   : > { %v3763_v15 = vld [vmem:[%s3735_s18 + $0x18] sm:$0xff]  ;;  %v377_v16 = vadd.f32 %v3751_v11, %v3748_v10  ;;  %v391_v17 = vmul.f32 %v3748_v10, %v3748_v10  ;;  %v392_v18 = vmul.f32 %v3751_v11, %v3751_v11  ;;  %v393_v21 = vmul.f32 %v3760_v14, %v3760_v14  ;;  %v3321_v3 = vld [vmem:[%s4651_s3 + $0x40] sm:$0xff]   ;;  %v3324_v8 = vld [vmem:[%s4651_s3 + $0x48] sm:$0xff]  }
  0x4a   : > { %3089 = vmatpush3.bf16.msra.mxu1 %v3738_v7  ;;  %v384_v20 = vadd.f32 %v3763_v15, %v3760_v14  ;;  %v394_v22 = vmul.f32 %v3763_v15, %v3763_v15  ;;  %v436_v55 = vld [vmem:[%s4650_s2 + $0x78] sm:$0xff]  ;;  %v3322_v4 = vld [vmem:[%s4651_s3] sm:$0xff]   ;;  %v3326_v9 = vld [vmem:[%s4651_s3 + $0x88] sm:$0xff]  }
  0x4b   : > { %3090 = vmatprep.subr.bf16.mxu1 %v3569_v0  ;;  %v378_v23 = vrot.slane %v377_v16, 4  ;;  %v395_v24 = vadd.f32 %v392_v18, %v391_v17  ;;  %v3822_v61 = vpack.c.bf16 %v436_v55, %v435_v54  ;;  %v3323_v6 = vld [vmem:[%s4651_s3 + $0x80] sm:$0xff]   ;;  %v3325_v12 = vld [vmem:[%s4651_s3 + $0x8] sm:$0xff]   ;;  %v3327_v13 = vld [vmem:[%s4651_s3 + $0x50] sm:$0xff]  }
  0x4c   : > { %v385_v25 = vrot.slane %v384_v20, 4  ;;  %v402_v26 = vadd.f32 %v394_v22, %v393_v21  ;;  %2989 = vmatprep.subr.bf16.mxu0 %v3323_v6  ;;  %v3328_v17 = vld [vmem:[%s4651_s3 + $0x10] sm:$0xff]   ;;  %v3330_v18 = vld [vmem:[%s4651_s3 + $0x58] sm:$0xff]   ;;  %v3333_v22 = vld [vmem:[%s4651_s3 + $0x60] sm:$0xff]  }
  0x4d   : > { %v379_v29 = vadd.f32 %v378_v23, %v377_v16  ;;  %v396_v30 = vrot.slane %v395_v24, 4  ;;  %2990 = vmatpush3.bf16.msra.mxu0 %v3323_v6  ;;  %v3329_v16 = vld [vmem:[%s4651_s3 + $0x90] sm:$0xff]   ;;  %v3331_v21 = vld [vmem:[%s4651_s3 + $0x18] sm:$0xff]   ;;  %v3335_v23 = vld [vmem:[%s4651_s3 + $0xa0] sm:$0xff]  }
  0x4e   : > { %3092 = vmatpush3.bf16.msra.mxu1 %v3772_v19  ;;  %v386_v32 = vadd.f32 %v385_v25, %v384_v20  ;;  %v403_v33 = vrot.slane %v402_v26, 4  ;;  %2991 = vmatprep.subr.bf16.mxu0 %v3326_v9  ;;  %v3332_v20 = vld [vmem:[%s4651_s3 + $0x98] sm:$0xff]   ;;  %v3336_v25 = vld [vmem:[%s4651_s3 + $0x68] sm:$0xff]   ;;  %v3339_v28 = vld [vmem:[%s4651_s3 + $0x70] sm:$0xff]  }
  0x4f   : > { %3093 = vmatprep.subr.bf16.mxu1 %v3569_v0  ;;  %v380_v34 = vrot.slane %v379_v29, 2  ;;  %v397_v35 = vadd.f32 %v396_v30, %v395_v24  ;;  %v3334_v24 = vld [vmem:[%s4651_s3 + $0x20] sm:$0xff]   ;;  %v3337_v27 = vld [vmem:[%s4651_s3 + $0x28] sm:$0xff]   ;;  %v3340_v30 = vld [vmem:[%s4651_s3 + $0x30] sm:$0xff]  }
  0x50   : > { %v387_v36 = vrot.slane %v386_v32, 2  ;;  %v404_v37 = vadd.f32 %v403_v33, %v402_v26  ;;  %v3338_v26 = vld [vmem:[%s4651_s3 + $0xa8] sm:$0xff]   ;;  %v3343_v33 = vld [vmem:[%s4651_s3 + $0x38] sm:$0xff]   ;;  %vm2696_vm5 = vmneg %vm624_vm4 }
  0x51   : > { %v381_v40 = vadd.f32 %v380_v34, %v379_v29  ;;  %v398_v41 = vrot.slane %v397_v35, 2  ;;  %2992 = vmatpush3.bf16.msra.mxu0 %v3326_v9  ;;  %v3341_v29 = vld [vmem:[%s4651_s3 + $0xb0] sm:$0xff]   ;;  %v3344_v34 = vld [vmem:[%s4651_s3 + $0xb8] sm:$0xff]   ;;  %vm3931_vm8 = vmpackc.low %vm3573_vm7, %vm2696_vm5 }
  0x52   : > { %3095 = vmatpush3.bf16.msra.mxu1 %v3788_v31  ;;  %v388_v43 = vadd.f32 %v387_v36, %v386_v32  ;;  %v405_v44 = vrot.slane %v404_v37, 2  ;;  %2993 = vmatprep.subr.bf16.mxu0 %v3329_v16  ;;  %v3342_v32 = vld [vmem:[%s4651_s3 + $0x78] sm:$0xff]   ;;  %vm3938_vm9 = vmpackc.low %vm637_vm6, %vm3573_vm7 }
  0x53   : > { %3096 = vmatprep.subr.bf16.mxu1 %v3569_v0  ;;  %v382_v45 = vrot.slane %v381_v40, 1  ;;  %v399_v46 = vadd.f32 %v398_v41, %v397_v35  ;;  %v3572_v35 = vmov 1966171168  }
  0x54   : > { %v389_v47 = vrot.slane %v388_v43, 1  ;;  %v406_v48 = vadd.f32 %v405_v44, %v404_v37  ;;  %v509_v36 = vunpack.c.l.s4 %v3572_v35  ;;  %v511_v37 = vlaneseq }
  0x55   : > { %v400_v51 = vrot.slane %v399_v46, 1  ;;  %v383_v57 = vadd.f32 %v382_v45, %v381_v40  ;;  %2994 = vmatpush3.bf16.msra.mxu0 %v3329_v16 }
  0x56   : > { %3098 = vmatpush3.bf16.msra.mxu1 %v3798_v42  ;;  %v407_v53 = vrot.slane %v406_v48, 1  ;;  %v390_v58 = vadd.f32 %v389_v47, %v388_v43  ;;  %2995 = vmatprep.subr.bf16.mxu0 %v3332_v20  ;;  %v510_v38 = vunpack.c.0.s8 %v509_v36  ;;  %v3902_v39 = vshrl.u32 %v511_v37, 7 }
  0x57   : > { %3099 = vmatprep.subr.bf16.mxu1 %v3569_v0  ;;  %v401_v59 = vadd.f32 %v400_v51, %v399_v46 }
  0x58   : > { %v408_v60 = vadd.f32 %v407_v53, %v406_v48  ;;  %v412_v62 = vsel %vm411_vm1, %v390_v58, %v383_v57  ;;  %v3905_v40 = vsub.s32 %v510_v38, %v3902_v39 }
  0x59   : > { %2996 = vmatpush3.bf16.msra.mxu0 %v3332_v20 }
  0x5a   : > { %3101 = vmatpush3.bf16.msra.mxu1 %v3808_v52  ;;  %v417_v63 = vsel %vm416_vm2, %v408_v60, %v401_v59  ;;  %2997 = vmatprep.subr.bf16.mxu0 %v3335_v23  ;;  %v3911_v60 = vsub.s32 0, %v3902_v39 }
  0x5b   : > { %3102 = vmatprep.subr.bf16.mxu1 %v3569_v0  ;;  %v420_v2 = vsel %vm419_vm3, %v412_v62, %v417_v63 }
  0x5d   : > { %2998 = vmatpush3.bf16.msra.mxu0 %v3335_v23 }
  0x5e   : > { %3104 = vmatpush3.bf16.msra.mxu1 %v3818_v56  ;;  %2999 = vmatprep.subr.bf16.mxu0 %v3338_v26 }
  0x5f   : > { %3105 = vmatprep.subr.bf16.mxu1 %v3569_v0 }
  0x61   : > { %3000 = vmatpush3.bf16.msra.mxu0 %v3338_v26 }
  0x62   : > { %3107 = vmatpush3.bf16.msra.mxu1 %v3822_v61  ;;  %3001 = vmatprep.subr.bf16.mxu0 %v3341_v29 }
  0x63   : > { %2851 = vmatprep.subr.bf16.mxu1 %v3321_v3  ;;  %v586_v3 = vsub.s32 1, %v3902_v39 }
  0x65   : > { %2987 = vmatmul.mubr.f32.vlgmr.msra.gmra.mrb[0].mxu1 %v420_v2  ;;  %3002 = vmatpush3.bf16.msra.mxu0 %v3341_v29  ;;  %v3918_v2 = vld [vmem:[%s4649_s1] sm:$0xf] }
  0x66   : > { %2852 = vmatpush3.bf16.msra.mxu1 %v3322_v4  ;;  %3003 = vmatprep.subr.bf16.mxu0 %v3344_v34 }
  0x67   : > { %2853 = vmatprep.subr.bf16.mxu1 %v3324_v8 }
  0x69   : > { %3004 = vmatpush3.bf16.msra.mxu0 %v3344_v34 }
  0x6a   : > { %2854 = vmatpush3.bf16.msra.mxu1 %v3325_v12  ;;  %v579_v12 = vrot.slane %v3918_v2, %v3911_v60 }
  0x6b   : > { %2855 = vmatprep.subr.bf16.mxu1 %v3327_v13 }
  0x6e   : > { %2856 = vmatpush3.bf16.msra.mxu1 %v3328_v17  ;;  %v587_v17 = vrot.slane %v3918_v2, %v586_v3 }
  0x6f   : > { %2857 = vmatprep.subr.bf16.mxu1 %v3330_v18 }
  0x72   : > { %2858 = vmatpush3.bf16.msra.mxu1 %v3331_v21 }
  0x73   : > { %2859 = vmatprep.subr.bf16.mxu1 %v3333_v22 }
  0x76   : > { %2860 = vmatpush3.bf16.msra.mxu1 %v3334_v24 }
  0x77   : > { %2861 = vmatprep.subr.bf16.mxu1 %v3336_v25 }
  0x7a   : > { %2862 = vmatpush3.bf16.msra.mxu1 %v3337_v27 }
  0x7b   : > { %2863 = vmatprep.subr.bf16.mxu1 %v3339_v28 }
  0x7e   : > { %2864 = vmatpush3.bf16.msra.mxu1 %v3340_v30 }
  0x7f   : > { %2865 = vmatprep.subr.bf16.mxu1 %v3342_v32 }
  0x82   : > { %2866 = vmatpush3.bf16.msra.mxu1 %v3343_v33 }
  0x83   : > { %3108 = vmatprep.subr.bf16.mxu1 %v3569_v0 }
 0x138   : > { %v503_v41 = vpop.f32.mrb[0].mxu1 }
 0x139   : > { %v514_v43 = vrot.slane %v503_v41, %v3905_v40  ;;  %v2988_v44 = vpop.f32.mrb[1].mxu1 }
 0x13b   : > { %v515_v45 = vcombine.high %v514_v43, %v514_v43  ;;  %v522_v46 = vrot.slane %v514_v43, %v3905_v40 }
 0x13d   : > { %v529_v47 = vrot.slane %v515_v45, %v3905_v40  ;;  %v532_v48 = vcombine.high %v522_v46, %v522_v46  ;;  %v536_v49 = vmul.f32 %v522_v46, %v522_v46  ;;  %v545_v62 = vrot.slane %v522_v46, %v3911_v60 }
 0x13f   : > { %v533_v50 = vcombine.high %v529_v47, %v529_v47  ;;  %v537_v51 = vmul.f32 %v529_v47, %v529_v47  ;;  %v538_v53 = vsub.f32 %v532_v48, %v536_v49  ;;  %v549_v63 = vrot.slane %v529_v47, %v3911_v60 }
 0x140   : > { %v552_v6 = vsub.f32 %v3748_v10, %v545_v62  ;;  %v553_v8 = vsub.f32 %v3751_v11, %v545_v62  ;;  %v3442_v62 = vld [vmem:[%s4654_s6 + $0x154] ss:$8 sps:$4 sm:$0xff]  }
 0x141   : > { %v539_v54 = vsub.f32 %v533_v50, %v537_v51  ;;  %v540_v55 = vmax.f32 %v538_v53, 0.0  ;;  %v554_v16 = vsub.f32 %v3760_v14, %v549_v63  ;;  %v555_v18 = vsub.f32 %v3763_v15, %v549_v63 }
 0x143   : > { %v541_v57 = vmax.f32 %v539_v54, 0.0  ;;  %v556_v58 = vadd.f32 1e-05, %v540_v55 }
 0x145   : > { %v557_v59 = vadd.f32 1e-05, %v541_v57  ;;  %3449 = vrsqrt.f32 %v556_v58 }
 0x147   : > { %3451 = vrsqrt.f32 %v557_v59 }
 0x14f   : > { %v3450_v4 = vpop.eup %3449 }
 0x150   : > { %v565_v9 = vrot.slane %v3450_v4, %v3911_v60 }
 0x151   : > { %v3452_v13 = vpop.eup %3451 }
 0x152   : > { %v569_v20 = vrot.slane %v3452_v13, %v3911_v60  ;;  %v572_v21 = vmul.f32 %v565_v9, %v552_v6  ;;  %v573_v22 = vmul.f32 %v565_v9, %v553_v8  ;;  %v2198_v6 = vld [vmem:[%s4656_s8 + $0x58] sm:$0xff] }
 0x154   : > { %v574_v23 = vmul.f32 %v569_v20, %v554_v16  ;;  %v575_v10 = vmul.f32 %v569_v20, %v555_v18  ;;  %v580_v24 = vmul.f32 %v579_v12, %v572_v21  ;;  %v581_v11 = vmul.f32 %v579_v12, %v573_v22 }
 0x156   : > { %v588_v25 = vadd.f32 %v587_v17, %v580_v24  ;;  %v589_v26 = vadd.f32 %v587_v17, %v581_v11  ;;  %v582_v27 = vmul.f32 %v579_v12, %v574_v23  ;;  %v583_v28 = vmul.f32 %v579_v12, %v575_v10 }
 0x158   : > { %v2668_v29 = vmul.f32 -1.442695, %v588_v25  ;;  %v2669_v30 = vmul.f32 -1.442695, %v589_v26  ;;  %v590_v32 = vadd.f32 %v587_v17, %v582_v27  ;;  %v591_v14 = vadd.f32 %v587_v17, %v583_v28 }
 0x15a   : > { %3453 = vpow2.f32 %v2668_v29  ;;  %v2670_v33 = vmul.f32 -1.442695, %v590_v32  ;;  %v2671_v34 = vmul.f32 -1.442695, %v591_v14 }
 0x15b   : > { %3455 = vpow2.f32 %v2669_v30 }
 0x15c   : > { %3457 = vpow2.f32 %v2670_v33 }
 0x15d   : > { %3459 = vpow2.f32 %v2671_v34 }
 0x164   : > { %v3454_v15 = vpop.eup %3453 }
 0x165   : > { %v3456_v35 = vpop.eup %3455  ;;  %v604_v36 = vadd.f32 1.0, %v3454_v15 }
 0x166   : > { %v3458_v37 = vpop.eup %3457  ;;  %v605_v38 = vadd.f32 1.0, %v3456_v35 }
 0x167   : > { %v3460_v41 = vpop.eup %3459  ;;  %3461 = vrcp.f32 %v604_v36  ;;  %v606_v43 = vadd.f32 1.0, %v3458_v37 }
 0x168   : > { %3463 = vrcp.f32 %v605_v38  ;;  %v607_v44 = vadd.f32 1.0, %v3460_v41 }
 0x169   : > { %3465 = vrcp.f32 %v606_v43 }
 0x16a   : > { %3467 = vrcp.f32 %v607_v44 }
 0x171   : > { %v3462_v45 = vpop.eup %3461 }
 0x172   : > { %v3464_v46 = vpop.eup %3463  ;;  %v616_v47 = vmul.f32 %v3462_v45, %v588_v25 }
 0x173   : > { %v3466_v48 = vpop.eup %3465  ;;  %v617_v49 = vmul.f32 %v3464_v46, %v589_v26 }
 0x174   : > { %v3468_v50 = vpop.eup %3467  ;;  %v625_v51 = vrot.slane %v616_v47, 7  ;;  %v638_v53 = vrot.slane %v616_v47, 1  ;;  %v618_v54 = vmul.f32 %v3466_v48, %v590_v32 }
 0x175   : > { %v626_v55 = vrot.slane %v617_v49, 7  ;;  %v651_v57 = vpack.c.bf16 %v617_v49, %v616_v47  ;;  %v639_v58 = vrot.slane %v617_v49, 1  ;;  %v619_v59 = vmul.f32 %v3468_v50, %v591_v14 }
 0x176   : > { %v641_v63 = vrot.slane %v618_v54, 1  ;;  %v628_v17 = vrot.slane %v618_v54, 7 }
 0x177   : > { %880 = vmatprep.mubr.bf16.mxu1 %v651_v57  ;;  %v627_v3 = vsel %vm624_vm4, %v625_v51, %v626_v55  ;;  %v640_v4 = vsel %vm637_vm6, %v638_v53, %v639_v58  ;;  %v642_v8 = vrot.slane %v619_v59, 1  ;;  %v654_v13 = vpack.c.bf16 %v619_v59, %v618_v54 }
 0x178   : > { %v2698_v9 = vpack.c.bf16 %v627_v3, %v625_v51  ;;  %v2705_v12 = vpack.c.bf16 %v639_v58, %v640_v4  ;;  %v629_v18 = vrot.slane %v619_v59, 7 }
 0x179   : > { %v643_v16 = vsel %vm637_vm6, %v641_v63, %v642_v8 }
 0x17a   : > { %2699 = vmatmul.mubr.msk.bf16.vlgmr.msra.gmra.mrb[4].mxu1 %vm3931_vm8, %v2698_v9  ;;  %3005 = vmatprep.mubr.msk.bf16.mxu0 %vm3938_vm9, %v2705_v12  ;;  %v2708_v20 = vpack.c.bf16 %v642_v8, %v643_v16  ;;  %v630_v21 = vsel %vm624_vm4, %v628_v17, %v629_v18 }
 0x17b   : > { %888 = vmatprep.mubr.bf16.mxu1 %v654_v13  ;;  %3110 = vmatpush3.bf16.msra.mxu1 %v3727_v5  ;;  %v2702_v22 = vpack.c.bf16 %v630_v21, %v628_v17  ;;  %v3345_v21 = vld [vmem:[#allocation2 + $0x40] sm:$0xff]  }
 0x17c   : > { %3006 = vmatmul.mubr.msk.bf16.vlgmr.msra.gmra.mrb[0].mxu0 %vm3938_vm9, %v2708_v20  ;;  %3111 = vmatprep.subr.bf16.mxu1 %v3569_v0 }
 0x17d   : > { %2906 = vmatprep.subr.bf16.mxu0 %v3345_v21 }
 0x17f   : > { %3113 = vmatpush3.bf16.msra.mxu1 %v3738_v7 }
 0x180   : > { %3114 = vmatprep.subr.bf16.mxu1 %v3569_v0 }
 0x182   : > { %2703 = vmatmul.mubr.msk.bf16.gmra.mrb[8].mxu1 %vm3931_vm8, %v2702_v22  ;;  %v3346_v22 = vld [vmem:[#allocation2] sm:$0xff]  }
 0x183   : > { %3116 = vmatpush3.bf16.msra.mxu1 %v3772_v19  ;;  %3041 = vmatprep.mubr.msk.f32.mxu1 %vm3570_vm0, %v3571_v1 }
 0x184   : > { %3117 = vmatprep.subr.bf16.mxu1 %v3569_v0  ;;  %2907 = vmatpush3.bf16.msra.mxu0 %v3346_v22 }
 0x187   : > { %3119 = vmatpush3.bf16.msra.mxu1 %v3788_v31 }
 0x188   : > { %3120 = vmatprep.subr.bf16.mxu1 %v3569_v0 }
 0x18b   : > { %3122 = vmatpush3.bf16.msra.mxu1 %v3798_v42 }
 0x18c   : > { %3123 = vmatprep.subr.bf16.mxu1 %v3569_v0 }
 0x18f   : > { %3125 = vmatpush3.bf16.msra.mxu1 %v3808_v52 }
 0x190   : > { %3126 = vmatprep.subr.bf16.mxu1 %v3569_v0 }
 0x193   : > { %3128 = vmatpush3.bf16.msra.mxu1 %v3818_v56 }
 0x194   : > { %3129 = vmatprep.subr.bf16.mxu1 %v3569_v0 }
 0x197   : > { %3131 = vmatpush3.bf16.msra.mxu1 %v3822_v61 }
 0x24d   : > { %v2867_v5 = vpop.f32.mrb[4].mxu1 }
 0x24e   : > { %v2868_v7 = vpop.f32.mrb[5].mxu1 }
 0x24f   : > { %v2869_v19 = vadd.f32 %v2868_v7, %v2867_v5  ;;  %v2870_v31 = vpop.f32.mrb[6].mxu1  ;;  %v3007_v23 = vpop.f32.mrb[0].mxu0  ;;  %v3347_v5 = vld [vmem:[#allocation2 + $0x80] sm:$0xff]   ;;  %v3348_v7 = vld [vmem:[#allocation2 + $0x48] sm:$0xff]  }
 0x250   : > { %v2871_v10 = vpop.f32.mrb[7].mxu1  ;;  %v931_v24 = vpop.f32.mrb[1].mxu0  ;;  %3044 = vmatprep.subr.bf16.mxu1 %v3347_v5  ;;  %2908 = vmatprep.subr.bf16.mxu0 %v3348_v7 }
 0x251   : > { %v2872_v42 = vadd.f32 %v2871_v10, %v2870_v31  ;;  %v3969_v11 = vadd.f32 %v2869_v19, %v931_v24  ;;  %v3008_v25 = vpop.f32.mrb[2].mxu0  ;;  %v3350_v19 = vld [vmem:[#allocation2 + $0x88] sm:$0xff]   ;;  %v3353_v10 = vld [vmem:[#allocation2 + $0x90] sm:$0xff]  }
 0x252   : > { %v934_v52 = vpop.f32.mrb[3].mxu0  ;;  %v3349_v31 = vld [vmem:[#allocation2 + $0x8] sm:$0xff]   ;;  %v3352_v24 = vld [vmem:[#allocation2 + $0x10] sm:$0xff]  }
 0x253   : > { %v3971_v26 = vadd.f32 %v2872_v42, %v934_v52  ;;  %v960_v56 = vmul.f32 %v3969_v11, %v3969_v11  ;;  %2909 = vmatpush3.bf16.msra.mxu0 %v3349_v31  ;;  %v3354_v42 = vld [vmem:[#allocation2 + $0x58] sm:$0xff]  }
 0x254   : > { %v3355_v52 = vld [vmem:[#allocation2 + $0x18] sm:$0xff]  }
 0x255   : > { %v946_v0 = vadd.f32 %v3971_v26, %v3969_v11  ;;  %v961_v61 = vmul.f32 %v3971_v26, %v3971_v26  ;;  %v2873_v27 = vpop.f32.mrb[8].mxu1 }
 0x256   : > { %v2874_v28 = vpop.f32.mrb[9].mxu1 }
 0x257   : > { %v947_v29 = vrot.slane %v946_v0, 4  ;;  %v964_v30 = vadd.f32 %v961_v61, %v960_v56  ;;  %v2875_v32 = vadd.f32 %v2874_v28, %v2873_v27  ;;  %v2876_v14 = vpop.f32.mrb[10].mxu1  ;;  %v3357_v56 = vld [vmem:[#allocation2 + $0x60] sm:$0xff]   ;;  %v3360_v27 = vld [vmem:[#allocation2 + $0x68] sm:$0xff]  }
 0x258   : > { %v2877_v33 = vpop.f32.mrb[11].mxu1  ;;  %v3358_v61 = vld [vmem:[#allocation2 + $0x20] sm:$0xff]   ;;  %v3362_v28 = vld [vmem:[#allocation2 + $0xa8] sm:$0xff]  }
 0x259   : > { %v965_v34 = vrot.slane %v964_v30, 4  ;;  %v3979_v15 = vadd.f32 %v3007_v23, %v2875_v32  ;;  %v2878_v35 = vadd.f32 %v2877_v33, %v2876_v14  ;;  %v948_v36 = vadd.f32 %v947_v29, %v946_v0  ;;  %v3351_v23 = vld [vmem:[#allocation2 + $0x50] sm:$0xff]   ;;  %v3359_v0 = vld [vmem:[#allocation2 + $0xa0] sm:$0xff]   ;;  %v3361_v29 = vld [vmem:[#allocation2 + $0x28] sm:$0xff]  }
 0x25a   : > { %2910 = vmatprep.subr.bf16.mxu0 %v3351_v23  ;;  %v3365_v32 = vld [vmem:[#allocation2 + $0xb0] sm:$0xff]   ;;  %v3366_v33 = vld [vmem:[#allocation2 + $0x78] sm:$0xff]  }
 0x25b   : > { %v966_v37 = vadd.f32 %v965_v34, %v964_v30  ;;  %v3981_v38 = vadd.f32 %v3008_v25, %v2878_v35  ;;  %v962_v41 = vmul.f32 %v3979_v15, %v3979_v15  ;;  %v949_v45 = vrot.slane %v948_v36, 2  ;;  %v3356_v25 = vld [vmem:[#allocation2 + $0x98] sm:$0xff]   ;;  %2911 = vmatpush3.bf16.msra.mxu0 %v3352_v24  ;;  %v3363_v30 = vld [vmem:[#allocation2 + $0x70] sm:$0xff]  }
 0x25c   : > { %2912 = vmatprep.subr.bf16.mxu0 %v3354_v42  ;;  %v3364_v14 = vld [vmem:[#allocation2 + $0x30] sm:$0xff]   ;;  %v3367_v34 = vld [vmem:[#allocation2 + $0x38] sm:$0xff]  }
 0x25d   : > { %v953_v43 = vadd.f32 %v3981_v38, %v3979_v15  ;;  %v963_v44 = vmul.f32 %v3981_v38, %v3981_v38  ;;  %v967_v46 = vrot.slane %v966_v37, 2  ;;  %v950_v51 = vadd.f32 %v949_v45, %v948_v36  ;;  %v3368_v35 = vld [vmem:[#allocation2 + $0xb8] sm:$0xff]   ;;  %v3992_v36 = vld [vmem:[#allocation4] sm:$0xff]  }
 0x25f   : > { %v954_v47 = vrot.slane %v953_v43, 4  ;;  %v971_v48 = vadd.f32 %v963_v44, %v962_v41  ;;  %v968_v53 = vadd.f32 %v967_v46, %v966_v37  ;;  %v951_v59 = vrot.slane %v950_v51, 1  ;;  %2913 = vmatpush3.bf16.msra.mxu0 %v3355_v52  ;;  %v3379_v37 = vld [vmem:[%s4654_s6 + $0x4] ss:$8 sps:$4 sm:$0xff]  }
 0x260   : > { %2914 = vmatprep.subr.bf16.mxu0 %v3357_v56 }
 0x261   : > { %v955_v49 = vadd.f32 %v954_v47, %v953_v43  ;;  %v972_v50 = vrot.slane %v971_v48, 4  ;;  %v969_v63 = vrot.slane %v968_v53, 1  ;;  %v952_v12 = vadd.f32 %v951_v59, %v950_v51 }
 0x263   : > { %v956_v54 = vrot.slane %v955_v49, 2  ;;  %v973_v55 = vadd.f32 %v972_v50, %v971_v48  ;;  %v970_v13 = vadd.f32 %v969_v63, %v968_v53  ;;  %2915 = vmatpush3.bf16.msra.mxu0 %v3358_v61 }
 0x264   : > { %2916 = vmatprep.subr.bf16.mxu0 %v3360_v27 }
 0x265   : > { %v957_v57 = vadd.f32 %v956_v54, %v955_v49  ;;  %v974_v58 = vrot.slane %v973_v55, 2 }
 0x267   : > { %v958_v3 = vrot.slane %v957_v57, 1  ;;  %v975_v4 = vadd.f32 %v974_v58, %v973_v55  ;;  %2917 = vmatpush3.bf16.msra.mxu0 %v3361_v29 }
 0x268   : > { %2918 = vmatprep.subr.bf16.mxu0 %v3363_v30 }
 0x269   : > { %v959_v8 = vadd.f32 %v958_v3, %v957_v57  ;;  %v976_v9 = vrot.slane %v975_v4, 1  ;;  %v1128_v3 = vsub.s32 2, %v3902_v39 }
 0x26b   : > { %v977_v16 = vadd.f32 %v976_v9, %v975_v4  ;;  %v980_v17 = vsel %vm411_vm1, %v959_v8, %v952_v12  ;;  %2919 = vmatpush3.bf16.msra.mxu0 %v3364_v14 }
 0x26c   : > { %2920 = vmatprep.subr.bf16.mxu0 %v3366_v33 }
 0x26d   : > { %v984_v18 = vsel %vm416_vm2, %v977_v16, %v970_v13  ;;  %v1129_v16 = vrot.slane %v3918_v2, %v1128_v3  ;;  %v3382_v3 = vld [vmem:[%s4654_s6 + $0x14] ss:$8 sps:$4 sm:$0xff]  }
 0x26e   : > { %v986_v20 = vsel %vm419_vm3, %v980_v17, %v984_v18 }
 0x26f   : > { %3042 = vmatmul.mubr.f32.vlgmr.msra.gmra.mrb[2].mxu1 %v986_v20  ;;  %2921 = vmatpush3.bf16.msra.mxu0 %v3367_v34 }
 0x270   : > { %3045 = vmatpush3.bf16.msra.mxu1 %v3347_v5  ;;  %1935 = vmatprep.subr.bf16.mxu0 %v3379_v37 }
 0x271   : > { %3046 = vmatprep.subr.bf16.mxu1 %v3350_v19 }
 0x274   : > { %3047 = vmatpush3.bf16.msra.mxu1 %v3350_v19 }
 0x275   : > { %3048 = vmatprep.subr.bf16.mxu1 %v3353_v10 }
 0x278   : > { %3049 = vmatpush3.bf16.msra.mxu1 %v3353_v10 }
 0x279   : > { %3050 = vmatprep.subr.bf16.mxu1 %v3356_v25 }
 0x27c   : > { %3051 = vmatpush3.bf16.msra.mxu1 %v3356_v25 }
 0x27d   : > { %3052 = vmatprep.subr.bf16.mxu1 %v3359_v0 }
 0x280   : > { %3053 = vmatpush3.bf16.msra.mxu1 %v3359_v0 }
 0x281   : > { %3054 = vmatprep.subr.bf16.mxu1 %v3362_v28 }
 0x284   : > { %3055 = vmatpush3.bf16.msra.mxu1 %v3362_v28 }
 0x285   : > { %3056 = vmatprep.subr.bf16.mxu1 %v3365_v32 }
 0x288   : > { %3057 = vmatpush3.bf16.msra.mxu1 %v3365_v32 }
 0x289   : > { %3058 = vmatprep.subr.bf16.mxu1 %v3368_v35 }
 0x28c   : > { %3059 = vmatpush3.bf16.msra.mxu1 %v3368_v35 }
 0x28d   : > { %3064 = vmatprep.subr.bf16.mxu1 %v3992_v36 }
 0x342   : > { %v1053_v41 = vpop.f32.mrb[2].mxu1 }
 0x343   : > { %v1064_v43 = vrot.slane %v1053_v41, %v3905_v40  ;;  %v3043_v44 = vpop.f32.mrb[3].mxu1 }
 0x345   : > { %v1065_v45 = vcombine.high %v1064_v43, %v1064_v43  ;;  %v1072_v46 = vrot.slane %v1064_v43, %v3905_v40 }
 0x347   : > { %v1079_v47 = vrot.slane %v1065_v45, %v3905_v40  ;;  %v1082_v48 = vcombine.high %v1072_v46, %v1072_v46  ;;  %v1086_v49 = vmul.f32 %v1072_v46, %v1072_v46  ;;  %v1095_v63 = vrot.slane %v1072_v46, %v3911_v60 }
 0x348   : > { %v1136_v40 = vsub.s32 3, %v3902_v39 }
 0x349   : > { %v1083_v50 = vcombine.high %v1079_v47, %v1079_v47  ;;  %v1087_v51 = vmul.f32 %v1079_v47, %v1079_v47  ;;  %v1088_v53 = vsub.f32 %v1082_v48, %v1086_v49  ;;  %v1099_v4 = vrot.slane %v1079_v47, %v3911_v60 }
 0x34a   : > { %v1102_v9 = vsub.f32 %v3969_v11, %v1095_v63  ;;  %v1103_v12 = vsub.f32 %v3971_v26, %v1095_v63  ;;  %v1137_v20 = vrot.slane %v3918_v2, %v1136_v40 }
 0x34b   : > { %v1089_v54 = vsub.f32 %v1083_v50, %v1087_v51  ;;  %v1090_v55 = vmax.f32 %v1088_v53, 0.0  ;;  %v1104_v18 = vsub.f32 %v3979_v15, %v1099_v4  ;;  %v1105_v21 = vsub.f32 %v3981_v38, %v1099_v4 }
 0x34d   : > { %v1091_v57 = vmax.f32 %v1089_v54, 0.0  ;;  %v1106_v58 = vadd.f32 1e-05, %v1090_v55  ;;  %v3377_v54 = vld [vmem:[%s4654_s6] ss:$8 sps:$4 sm:$0xff]  }
 0x34f   : > { %v1107_v59 = vadd.f32 1e-05, %v1091_v57  ;;  %3469 = vrsqrt.f32 %v1106_v58  ;;  %v3489_v58 = vld [vmem:[%s3735_s18] sm:$0xff] }
 0x351   : > { %3471 = vrsqrt.f32 %v1107_v59  ;;  %v3490_v59 = vld [vmem:[%s3735_s18 + $0x8] sm:$0xff] }
 0x352   : > { %v1494_v63 = vpack.c.bf16 %v3490_v59, %v3489_v58 }
 0x359   : > { %v3470_v8 = vpop.eup %3469 }
 0x35a   : > { %v1115_v13 = vrot.slane %v3470_v8, %v3911_v60 }
 0x35b   : > { %v3472_v17 = vpop.eup %3471 }
 0x35c   : > { %v1119_v22 = vrot.slane %v3472_v17, %v3911_v60  ;;  %v1122_v5 = vmul.f32 %v1115_v13, %v1102_v9  ;;  %v1123_v39 = vmul.f32 %v1115_v13, %v1103_v12  ;;  %v3370_v13 = vld [vmem:[#allocation4 + $0x8] sm:$0xff]  }
 0x35d   : > { %v3385_v17 = vld [vmem:[%s4654_s6 + $0x24] ss:$8 sps:$4 sm:$0xff]  }
 0x35e   : > { %v1124_v7 = vmul.f32 %v1119_v22, %v1104_v18  ;;  %v1125_v19 = vmul.f32 %v1119_v22, %v1105_v21  ;;  %v1130_v11 = vmul.f32 %v1129_v16, %v1122_v5  ;;  %v1131_v31 = vmul.f32 %v1129_v16, %v1123_v39  ;;  %v3383_v21 = vld [vmem:[%s4654_s6 + $0x20] ss:$8 sps:$4 sm:$0xff]   ;;  %v3388_v5 = vld [vmem:[%s4654_s6 + $0x34] ss:$8 sps:$4 sm:$0xff]   ;;  %v3386_v39 = vld [vmem:[%s4654_s6 + $0x30] ss:$8 sps:$4 sm:$0xff]  }
 0x360   : > { %v1138_v26 = vadd.f32 %v1137_v20, %v1130_v11  ;;  %v1139_v23 = vadd.f32 %v1137_v20, %v1131_v31  ;;  %v1132_v10 = vmul.f32 %v1129_v16, %v1124_v7  ;;  %v1133_v24 = vmul.f32 %v1129_v16, %v1125_v19  ;;  %v3380_v16 = vld [vmem:[%s4654_s6 + $0x10] ss:$8 sps:$4 sm:$0xff]   ;;  %v3391_v7 = vld [vmem:[%s4654_s6 + $0x44] ss:$8 sps:$4 sm:$0xff]   ;;  %v3389_v11 = vld [vmem:[%s4654_s6 + $0x40] ss:$8 sps:$4 sm:$0xff]  }
 0x361   : > { %v3373_v19 = vld [vmem:[#allocation4 + $0x20] sm:$0xff]   ;;  %v3394_v31 = vld [vmem:[%s4654_s6 + $0x54] ss:$8 sps:$4 sm:$0xff]  }
 0x362   : > { %v2710_v42 = vmul.f32 -1.442695, %v1138_v26  ;;  %v2711_v25 = vmul.f32 -1.442695, %v1139_v23  ;;  %v1140_v52 = vadd.f32 %v1137_v20, %v1132_v10  ;;  %v1141_v15 = vadd.f32 %v1137_v20, %v1133_v24  ;;  %v3371_v20 = vld [vmem:[#allocation4 + $0x10] sm:$0xff]   ;;  %v3376_v24 = vld [vmem:[#allocation4 + $0x38] sm:$0xff]  }
 0x363   : > { %v3375_v10 = vld [vmem:[#allocation4 + $0x30] sm:$0xff]  }
 0x364   : > { %3473 = vpow2.f32 %v2710_v42  ;;  %v2712_v2 = vmul.f32 -1.442695, %v1140_v52  ;;  %v2713_v56 = vmul.f32 -1.442695, %v1141_v15  ;;  %v3491_v42 = vld [vmem:[%s3735_s18 + $0x10] sm:$0xff] }
 0x365   : > { %3475 = vpow2.f32 %v2711_v25  ;;  %v3492_v25 = vld [vmem:[%s3735_s18 + $0x18] sm:$0xff] }
 0x366   : > { %3477 = vpow2.f32 %v2712_v2  ;;  %v3395_v2 = vld [vmem:[%s4654_s6 + $0x60] ss:$8 sps:$4 sm:$0xff]  }
 0x367   : > { %3479 = vpow2.f32 %v2713_v56  ;;  %v3400_v56 = vld [vmem:[%s4654_s6 + $0x74] ss:$8 sps:$4 sm:$0xff]  }
 0x36e   : > { %v3474_v60 = vpop.eup %3473 }
 0x36f   : > { %v3476_v38 = vpop.eup %3475  ;;  %v1154_v0 = vadd.f32 1.0, %v3474_v60  ;;  %v3398_v60 = vld [vmem:[%s4654_s6 + $0x70] ss:$8 sps:$4 sm:$0xff]  }
 0x370   : > { %v3478_v61 = vpop.eup %3477  ;;  %v1155_v27 = vadd.f32 1.0, %v3476_v38  ;;  %v3403_v38 = vld [vmem:[%s4654_s6 + $0x84] ss:$8 sps:$4 sm:$0xff]  }
 0x371   : > { %v3480_v28 = vpop.eup %3479  ;;  %3481 = vrcp.f32 %v1154_v0  ;;  %v1156_v29 = vadd.f32 1.0, %v3478_v61  ;;  %v3401_v0 = vld [vmem:[%s4654_s6 + $0x80] ss:$8 sps:$4 sm:$0xff]   ;;  %v3406_v61 = vld [vmem:[%s4654_s6 + $0x94] ss:$8 sps:$4 sm:$0xff]  }
 0x372   : > { %3483 = vrcp.f32 %v1155_v27  ;;  %v1157_v30 = vadd.f32 1.0, %v3480_v28  ;;  %v3404_v27 = vld [vmem:[%s4654_s6 + $0x90] ss:$8 sps:$4 sm:$0xff]   ;;  %v3409_v28 = vld [vmem:[%s4654_s6 + $0xa4] ss:$8 sps:$4 sm:$0xff]  }
 0x373   : > { %3485 = vrcp.f32 %v1156_v29  ;;  %v3407_v29 = vld [vmem:[%s4654_s6 + $0xa0] ss:$8 sps:$4 sm:$0xff]  }
 0x374   : > { %3487 = vrcp.f32 %v1157_v30  ;;  %v3412_v30 = vld [vmem:[%s4654_s6 + $0xb4] ss:$8 sps:$4 sm:$0xff]  }
 0x37b   : > { %v3482_v32 = vpop.eup %3481 }
 0x37c   : > { %v3484_v14 = vpop.eup %3483  ;;  %v1166_v33 = vmul.f32 %v3482_v32, %v1138_v26  ;;  %v3374_v26 = vld [vmem:[#allocation4 + $0x28] sm:$0xff]   ;;  %v3410_v32 = vld [vmem:[%s4654_s6 + $0xb0] ss:$8 sps:$4 sm:$0xff]  }
 0x37d   : > { %v3486_v34 = vpop.eup %3485  ;;  %v1167_v35 = vmul.f32 %v3484_v14, %v1139_v23  ;;  %v3392_v23 = vld [vmem:[%s4654_s6 + $0x50] ss:$8 sps:$4 sm:$0xff]   ;;  %v3415_v14 = vld [vmem:[%s4654_s6 + $0xc4] ss:$8 sps:$4 sm:$0xff]  }
 0x37e   : > { %v3488_v37 = vpop.eup %3487  ;;  %v1174_v41 = vrot.slane %v1166_v33, 7  ;;  %v1186_v43 = vrot.slane %v1166_v33, 1  ;;  %v1168_v44 = vmul.f32 %v3486_v34, %v1140_v52  ;;  %v1495_v52 = vpack.c.bf16 %v3492_v25, %v3491_v42  ;;  %v3418_v34 = vld [vmem:[%s4654_s6 + $0xd4] ss:$8 sps:$4 sm:$0xff]  }
 0x37f   : > { %v1175_v45 = vrot.slane %v1167_v35, 7  ;;  %v1199_v46 = vpack.c.bf16 %v1167_v35, %v1166_v33  ;;  %v1187_v47 = vrot.slane %v1167_v35, 1  ;;  %v1169_v48 = vmul.f32 %v3488_v37, %v1141_v15  ;;  %v3397_v15 = vld [vmem:[%s4654_s6 + $0x64] ss:$8 sps:$4 sm:$0xff]   ;;  %v3413_v33 = vld [vmem:[%s4654_s6 + $0xc0] ss:$8 sps:$4 sm:$0xff]  }
 0x380   : > { %v1189_v49 = vrot.slane %v1168_v44, 1  ;;  %v1177_v8 = vrot.slane %v1168_v44, 7  ;;  %v3416_v35 = vld [vmem:[%s4654_s6 + $0xd0] ss:$8 sps:$4 sm:$0xff]   ;;  %v3421_v37 = vld [vmem:[%s4654_s6 + $0xe4] ss:$8 sps:$4 sm:$0xff]  }
 0x381   : > { %1428 = vmatprep.mubr.bf16.mxu0 %v1199_v46  ;;  %v1176_v50 = vsel %vm624_vm4, %v1174_v41, %v1175_v45  ;;  %v1188_v51 = vsel %vm637_vm6, %v1186_v43, %v1187_v47  ;;  %v1190_v53 = vrot.slane %v1169_v48, 1  ;;  %v1202_v4 = vpack.c.bf16 %v1169_v48, %v1168_v44  ;;  %v3424_v43 = vld [vmem:[%s4654_s6 + $0xf4] ss:$8 sps:$4 sm:$0xff]   ;;  %v3422_v44 = vld [vmem:[%s4654_s6 + $0xf0] ss:$8 sps:$4 sm:$0xff]  }
 0x382   : > { %v2740_v55 = vpack.c.bf16 %v1176_v50, %v1174_v41  ;;  %v2747_v57 = vpack.c.bf16 %v1187_v47, %v1188_v51  ;;  %v1178_v9 = vrot.slane %v1169_v48, 7  ;;  %v3419_v41 = vld [vmem:[%s4654_s6 + $0xe0] ss:$8 sps:$4 sm:$0xff]   ;;  %v3427_v45 = vld [vmem:[%s4654_s6 + $0x104] ss:$8 sps:$4 sm:$0xff]  }
 0x383   : > { %v1191_v40 = vsel %vm637_vm6, %v1189_v49, %v1190_v53 }
 0x384   : > { %2741 = vmatmul.mubr.msk.bf16.vlgmr.msra.gmra.mrb[4].mxu0 %vm3931_vm8, %v2740_v55  ;;  %3060 = vmatprep.mubr.msk.bf16.mxu1 %vm3938_vm9, %v2747_v57  ;;  %v2750_v12 = vpack.c.bf16 %v1190_v53, %v1191_v40  ;;  %v1179_v18 = vsel %vm624_vm4, %v1177_v8, %v1178_v9 }
 0x385   : > { %1436 = vmatprep.mubr.bf16.mxu0 %v1202_v4  ;;  %1936 = vmatpush1.bf16.msra.mxu0 %v3377_v54  ;;  %v2744_v22 = vpack.c.bf16 %v1179_v18, %v1177_v8 }
 0x386   : > { %3061 = vmatmul.mubr.msk.bf16.vlgmr.msra.gmra.mrb[12].mxu1 %vm3938_vm9, %v2750_v12  ;;  %1937 = vmatprep.subr.bf16.mxu0 %v3382_v3 }
 0x387   : > { %3065 = vmatpush3.bf16.msra.mxu1 %v3992_v36  ;;  %3080 = vmatprep.mubr.bf16.mxu1 %v1494_v63  ;;  %v3372_v36 = vld [vmem:[#allocation4 + $0x18] sm:$0xff]  }
 0x388   : > { %3066 = vmatprep.subr.bf16.mxu1 %v3370_v13 }
 0x389   : > { %1938 = vmatpush1.bf16.msra.mxu0 %v3380_v16 }
 0x38a   : > { %1939 = vmatprep.subr.bf16.mxu0 %v3385_v17 }
 0x38b   : > { %3067 = vmatpush3.bf16.msra.mxu1 %v3370_v13 }
 0x38c   : > { %2745 = vmatmul.mubr.msk.bf16.gmra.mrb[8].mxu0 %vm3931_vm8, %v2744_v22  ;;  %3068 = vmatprep.subr.bf16.mxu1 %v3371_v20 }
 0x38d   : > { %1940 = vmatpush1.bf16.msra.mxu0 %v3383_v21 }
 0x38e   : > { %1941 = vmatprep.subr.bf16.mxu0 %v3388_v5 }
 0x38f   : > { %3069 = vmatpush3.bf16.msra.mxu1 %v3371_v20 }
 0x390   : > { %3070 = vmatprep.subr.bf16.mxu1 %v3372_v36 }
 0x391   : > { %1942 = vmatpush1.bf16.msra.mxu0 %v3386_v39 }
 0x392   : > { %1943 = vmatprep.subr.bf16.mxu0 %v3391_v7 }
 0x393   : > { %3071 = vmatpush3.bf16.msra.mxu1 %v3372_v36 }
 0x394   : > { %3072 = vmatprep.subr.bf16.mxu1 %v3373_v19 }
 0x395   : > { %1944 = vmatpush1.bf16.msra.mxu0 %v3389_v11 }
 0x396   : > { %1945 = vmatprep.subr.bf16.mxu0 %v3394_v31 }
 0x397   : > { %3073 = vmatpush3.bf16.msra.mxu1 %v3373_v19 }
 0x398   : > { %3074 = vmatprep.subr.bf16.mxu1 %v3374_v26 }
 0x399   : > { %1946 = vmatpush1.bf16.msra.mxu0 %v3392_v23 }
 0x39a   : > { %1947 = vmatprep.subr.bf16.mxu0 %v3397_v15  ;;  %v3428_v15 = vld [vmem:[%s4654_s6 + $0x110] ss:$8 sps:$4 sm:$0xff]  }
 0x39b   : > { %3075 = vmatpush3.bf16.msra.mxu1 %v3374_v26 }
 0x39c   : > { %3076 = vmatprep.subr.bf16.mxu1 %v3375_v10 }
 0x39d   : > { %1948 = vmatpush1.bf16.msra.mxu0 %v3395_v2  ;;  %v3433_v2 = vld [vmem:[%s4654_s6 + $0x124] ss:$8 sps:$4 sm:$0xff]  }
 0x39e   : > { %1949 = vmatprep.subr.bf16.mxu0 %v3400_v56  ;;  %v3431_v56 = vld [vmem:[%s4654_s6 + $0x120] ss:$8 sps:$4 sm:$0xff]  }
 0x39f   : > { %3077 = vmatpush3.bf16.msra.mxu1 %v3375_v10  ;;  %v3425_v10 = vld [vmem:[%s4654_s6 + $0x100] ss:$8 sps:$4 sm:$0xff]  }
 0x3a0   : > { %3078 = vmatprep.subr.bf16.mxu1 %v3376_v24 }
 0x3a1   : > { %1950 = vmatpush1.bf16.msra.mxu0 %v3398_v60  ;;  %v3436_v60 = vld [vmem:[%s4654_s6 + $0x134] ss:$8 sps:$4 sm:$0xff]  }
 0x3a2   : > { %1951 = vmatprep.subr.bf16.mxu0 %v3403_v38  ;;  %v3434_v38 = vld [vmem:[%s4654_s6 + $0x130] ss:$8 sps:$4 sm:$0xff]  }
 0x3a3   : > { %3079 = vmatpush3.bf16.msra.mxu1 %v3376_v24 }
 0x3a5   : > { %1952 = vmatpush1.bf16.msra.mxu0 %v3401_v0  ;;  %v3574_v0 = vmov 0  }
 0x3a6   : > { %3081 = vmatmul.mubr.bf16.vlgmr.msra.gmra.mrb[12].mxu1 %v1495_v52  ;;  %1953 = vmatprep.subr.bf16.mxu0 %v3406_v61  ;;  %v3430_v52 = vld [vmem:[%s4654_s6 + $0x114] ss:$8 sps:$4 sm:$0xff]   ;;  %v3439_v61 = vld [vmem:[%s4654_s6 + $0x144] ss:$8 sps:$4 sm:$0xff]  }
 0x3a7   : > { %2138 = vmatprep.mubr.f32.mxu1 %v3571_v1 }
 0x3a9   : > { %1954 = vmatpush1.bf16.msra.mxu0 %v3404_v27  ;;  %v3437_v27 = vld [vmem:[%s4654_s6 + $0x140] ss:$8 sps:$4 sm:$0xff]  }
 0x3aa   : > { %1955 = vmatprep.subr.bf16.mxu0 %v3409_v28  ;;  %v3440_v28 = vld [vmem:[%s4654_s6 + $0x150] ss:$8 sps:$4 sm:$0xff]  }
 0x3ad   : > { %1956 = vmatpush1.bf16.msra.mxu0 %v3407_v29  ;;  %v3445_v29 = vld [vmem:[%s4654_s6 + $0x164] ss:$8 sps:$4 sm:$0xff]  }
 0x3ae   : > { %1957 = vmatprep.subr.bf16.mxu0 %v3412_v30  ;;  %v3443_v30 = vld [vmem:[%s4654_s6 + $0x160] ss:$8 sps:$4 sm:$0xff]  }
 0x3b1   : > { %1958 = vmatpush1.bf16.msra.mxu0 %v3410_v32  ;;  %v3448_v32 = vld [vmem:[%s4654_s6 + $0x174] ss:$8 sps:$4 sm:$0xff]  }
 0x3b2   : > { %1959 = vmatprep.subr.bf16.mxu0 %v3415_v14  ;;  %v3446_v14 = vld [vmem:[%s4654_s6 + $0x170] ss:$8 sps:$4 sm:$0xff]  }
 0x3b5   : > { %1960 = vmatpush1.bf16.msra.mxu0 %v3413_v33  ;;  %v2190_v33 = vld [vmem:[%s4656_s8 + $0x18] sm:$0xff] }
 0x3b6   : > { %1961 = vmatprep.subr.bf16.mxu0 %v3418_v34  ;;  %v2194_v34 = vld [vmem:[%s4656_s8 + $0x38] sm:$0xff] }
 0x3b9   : > { %1962 = vmatpush1.bf16.msra.mxu0 %v3416_v35  ;;  %v3204_v35 = vpack.c.bf16 %v2194_v34, %v2190_v33  ;;  %v2269_v33 = vld [vmem:[%s4656_s8 + $0x290] sm:$0xff] }
 0x3ba   : > { %1963 = vmatprep.subr.bf16.mxu0 %v3421_v37  ;;  %v2189_v37 = vld [vmem:[%s4656_s8 + $0x10] sm:$0xff] }
 0x3bb   : > { %v2273_v34 = vld [vmem:[%s4656_s8 + $0x2b0] sm:$0xff] }
 0x3bd   : > { %1964 = vmatpush1.bf16.msra.mxu0 %v3419_v41  ;;  %v2193_v41 = vld [vmem:[%s4656_s8 + $0x30] sm:$0xff] }
 0x3be   : > { %1965 = vmatprep.subr.bf16.mxu0 %v3424_v43  ;;  %v3206_v43 = vpack.c.bf16 %v2193_v41, %v2189_v37  ;;  %v2282_v37 = vld [vmem:[%s4656_s8 + $0x2f8] sm:$0xff]  ;;  %v3246_v41 = vpack.c.bf16 %v2273_v34, %v2269_v33  ;;  %v2043_v33 = vld [vmem:[%s4655_s7 + $0x10] sm:$0xff] }
 0x3c1   : > { %1966 = vmatpush1.bf16.msra.mxu0 %v3422_v44  ;;  %v2202_v44 = vld [vmem:[%s4656_s8 + $0x78] sm:$0xff] }
 0x3c2   : > { %1988 = vmatprep.subr.bf16.mxu0 %v3427_v45  ;;  %v3208_v45 = vpack.c.bf16 %v2202_v44, %v2198_v6  ;;  %v2277_v6 = vld [vmem:[%s4656_s8 + $0x2d0] sm:$0xff] }
 0x3c3   : > { %v2281_v44 = vld [vmem:[%s4656_s8 + $0x2f0] sm:$0xff] }
 0x457   : > { %v2922_v46 = vpop.f32.mrb[4].mxu0 }
 0x458   : > { %v2923_v47 = vpop.f32.mrb[5].mxu0 }
 0x459   : > { %v2924_v48 = vadd.f32 %v2923_v47, %v2922_v46  ;;  %v2925_v49 = vpop.f32.mrb[6].mxu0  ;;  %v2197_v46 = vld [vmem:[%s4656_s8 + $0x50] sm:$0xff] }
 0x45a   : > { %v2926_v50 = vpop.f32.mrb[7].mxu0  ;;  %v2201_v47 = vld [vmem:[%s4656_s8 + $0x70] sm:$0xff] }
 0x45b   : > { %v2927_v51 = vadd.f32 %v2926_v50, %v2925_v49  ;;  %v2206_v49 = vld [vmem:[%s4656_s8 + $0x98] sm:$0xff] }
 0x45c   : > { %v2210_v50 = vld [vmem:[%s4656_s8 + $0xb8] sm:$0xff] }
 0x45f   : > { %v2928_v53 = vpop.f32.mrb[8].mxu0 }
 0x460   : > { %v2929_v54 = vpop.f32.mrb[9].mxu0 }
 0x461   : > { %v2930_v55 = vadd.f32 %v2929_v54, %v2928_v53  ;;  %v2931_v57 = vpop.f32.mrb[10].mxu0  ;;  %v2205_v53 = vld [vmem:[%s4656_s8 + $0x90] sm:$0xff] }
 0x462   : > { %v2932_v58 = vpop.f32.mrb[11].mxu0  ;;  %v2209_v54 = vld [vmem:[%s4656_s8 + $0xb0] sm:$0xff] }
 0x463   : > { %v2933_v59 = vadd.f32 %v2932_v58, %v2931_v57  ;;  %v3214_v57 = vpack.c.bf16 %v2209_v54, %v2205_v53  ;;  %v2218_v58 = vld [vmem:[%s4656_s8 + $0xf8] sm:$0xff] }
 0x464   : > { %v2298_v53 = vld [vmem:[%s4656_s8 + $0x378] sm:$0xff] }
 0x479   : > { %v3082_v63 = vpop.f32.mrb[12].mxu1 }
 0x47a   : > { %v3268_v3 = vadd.f32 %v3082_v63, %v2930_v55  ;;  %v1594_v4 = vpop.f32.mrb[13].mxu1  ;;  %v2214_v55 = vld [vmem:[%s4656_s8 + $0xd8] sm:$0xff]  ;;  %v2213_v63 = vld [vmem:[%s4656_s8 + $0xd0] sm:$0xff] }
 0x47b   : > { %v3269_v40 = vadd.f32 %v2924_v48, %v1594_v4  ;;  %v3083_v8 = vpop.f32.mrb[14].mxu1  ;;  %v3210_v48 = vpack.c.bf16 %v2201_v47, %v2197_v46  ;;  %v2222_v4 = vld [vmem:[%s4656_s8 + $0x118] sm:$0xff]  ;;  %v3250_v47 = vpack.c.bf16 %v2281_v44, %v2277_v6  ;;  %v2224_v6 = vld [vmem:[%s4656_s8 + $0x128] sm:$0xff] }
 0x47c   : > { %v3270_v9 = vadd.f32 %v3083_v8, %v2933_v59  ;;  %v1597_v12 = vpop.f32.mrb[15].mxu1  ;;  %v1620_v13 = vrot.slane %v3268_v3, 7  ;;  %v1632_v16 = vrot.slane %v3268_v3, 1  ;;  %v3216_v59 = vpack.c.bf16 %v2218_v58, %v2214_v55  ;;  %v2290_v46 = vld [vmem:[%s4656_s8 + $0x338] sm:$0xff]  ;;  %v2297_v58 = vld [vmem:[%s4656_s8 + $0x370] sm:$0xff] }
 0x47d   : > { %v3271_v17 = vadd.f32 %v2927_v51, %v1597_v12  ;;  %v1617_v18 = vrot.slane %v3269_v40, 7  ;;  %v1629_v5 = vrot.slane %v3269_v40, 1  ;;  %v3212_v51 = vpack.c.bf16 %v2210_v50, %v2206_v49  ;;  %v2221_v12 = vld [vmem:[%s4656_s8 + $0x110] sm:$0xff]  ;;  %v2044_v44 = vld [vmem:[%s4655_s7 + $0x18] sm:$0xff] }
 0x47e   : > { %v1621_v20 = vrot.slane %v3270_v9, 7  ;;  %v1633_v21 = vrot.slane %v3270_v9, 1  ;;  %v1645_v22 = vpack.c.bf16 %v3270_v9, %v3268_v3  ;;  %v2217_v3 = vld [vmem:[%s4656_s8 + $0xf0] sm:$0xff] }
 0x47f   : > { %v1618_v36 = vrot.slane %v3271_v17, 7  ;;  %v1630_v39 = vrot.slane %v3271_v17, 1  ;;  %v1642_v7 = vpack.c.bf16 %v3271_v17, %v3269_v40  ;;  %v2226_v40 = vld [vmem:[%s4656_s8 + $0x138] sm:$0xff]  ;;  %v3218_v8 = vpack.c.bf16 %v2217_v3, %v2213_v63  ;;  %v2285_v49 = vld [vmem:[%s4656_s8 + $0x310] sm:$0xff] }
 0x480   : > { %v1634_v19 = vsel %vm637_vm6, %v1632_v16, %v1633_v21  ;;  %v1622_v11 = vsel %vm624_vm4, %v1620_v13, %v1621_v20  ;;  %v3220_v9 = vpack.c.bf16 %v2226_v40, %v2222_v4  ;;  %v2230_v16 = vld [vmem:[%s4656_s8 + $0x158] sm:$0xff]  ;;  %v2289_v50 = vld [vmem:[%s4656_s8 + $0x330] sm:$0xff] }
 0x481   : > { %v2820_v31 = vpack.c.bf16 %v1633_v21, %v1634_v19  ;;  %v1619_v26 = vsel %vm624_vm4, %v1617_v18, %v1618_v36  ;;  %v1631_v23 = vsel %vm637_vm6, %v1629_v5, %v1630_v39  ;;  %1967 = vmatprep.mubr.bf16.mxu0 %v1642_v7  ;;  %v2814_v24 = vpack.c.bf16 %v1622_v11, %v1620_v13  ;;  %v2225_v13 = vld [vmem:[%s4656_s8 + $0x130] sm:$0xff]  ;;  %v2234_v17 = vld [vmem:[%s4656_s8 + $0x178] sm:$0xff] }
 0x482   : > { %v2810_v42 = vpack.c.bf16 %v1619_v26, %v1617_v18  ;;  %v2817_v25 = vpack.c.bf16 %v1630_v39, %v1631_v23  ;;  %v3222_v18 = vpack.c.bf16 %v2225_v13, %v2221_v12  ;;  %v3224_v20 = vpack.c.bf16 %v2234_v17, %v2230_v16  ;;  %v2229_v21 = vld [vmem:[%s4656_s8 + $0x150] sm:$0xff]  ;;  %v2238_v5 = vld [vmem:[%s4656_s8 + $0x198] sm:$0xff] }
 0x483   : > { %v2242_v36 = vld [vmem:[%s4656_s8 + $0x1b8] sm:$0xff]  ;;  %v2237_v19 = vld [vmem:[%s4656_s8 + $0x190] sm:$0xff]  ;;  %v3254_v54 = vpack.c.bf16 %v2289_v50, %v2285_v49  ;;  %v2228_v49 = vld [vmem:[%s4656_s8 + $0x148] sm:$0xff] }
 0x484   : > { %2811 = vmatmul.mubr.msk.bf16.vlgmr.msra.gmra.mrb[12].mxu0 %vm3931_vm8, %v2810_v42  ;;  %v3228_v7 = vpack.c.bf16 %v2242_v36, %v2238_v5  ;;  %v2241_v11 = vld [vmem:[%s4656_s8 + $0x1b0] sm:$0xff]  ;;  %v2250_v26 = vld [vmem:[%s4656_s8 + $0x1f8] sm:$0xff]  ;;  %v2232_v50 = vld [vmem:[%s4656_s8 + $0x168] sm:$0xff] }
 0x485   : > { %1989 = vmatpush1.bf16.msra.mxu0 %v3425_v10  ;;  %1977 = vmatprep.mubr.bf16.mxu0 %v1645_v22  ;;  %v2233_v22 = vld [vmem:[%s4656_s8 + $0x170] sm:$0xff]  ;;  %v3230_v23 = vpack.c.bf16 %v2241_v11, %v2237_v19  ;;  %v2306_v63 = vld [vmem:[%s4656_s8 + $0x3b8] sm:$0xff]  ;;  %v2192_v19 = vld [vmem:[%s4656_s8 + $0x28] sm:$0xff] }
 0x486   : > { %1990 = vmatprep.subr.bf16.mxu0 %v3430_v52  ;;  %v3226_v39 = vpack.c.bf16 %v2233_v22, %v2229_v21  ;;  %v2249_v42 = vld [vmem:[%s4656_s8 + $0x1f0] sm:$0xff]  ;;  %v2258_v52 = vld [vmem:[%s4656_s8 + $0x238] sm:$0xff] }
 0x487   : > { %v2301_v40 = vld [vmem:[%s4656_s8 + $0x390] sm:$0xff]  ;;  %v2314_v12 = vld [vmem:[%s4656_s8 + $0x3f8] sm:$0xff] }
 0x489   : > { %1991 = vmatpush1.bf16.msra.mxu0 %v3428_v15 }
 0x48a   : > { %1992 = vmatprep.subr.bf16.mxu0 %v3433_v2 }
 0x48c   : > { %2815 = vmatmul.mubr.msk.bf16.gmra.mrb[16].mxu0 %vm3931_vm8, %v2814_v24  ;;  %v2245_v24 = vld [vmem:[%s4656_s8 + $0x1d0] sm:$0xff] }
 0x48d   : > { %1993 = vmatpush1.bf16.msra.mxu0 %v3431_v56  ;;  %2020 = vmatprep.mubr.bf16.mxu0 %v3574_v0  ;;  %v3234_v15 = vpack.c.bf16 %v2249_v42, %v2245_v24  ;;  %v2253_v56 = vld [vmem:[%s4656_s8 + $0x210] sm:$0xff]  ;;  %v2187_v24 = vld [vmem:[%s4656_s8] sm:$0xff] }
 0x48e   : > { %1994 = vmatprep.subr.bf16.mxu0 %v3436_v60  ;;  %v2257_v60 = vld [vmem:[%s4656_s8 + $0x230] sm:$0xff]  ;;  %v2191_v42 = vld [vmem:[%s4656_s8 + $0x20] sm:$0xff] }
 0x491   : > { %1995 = vmatpush1.bf16.msra.mxu0 %v3434_v38  ;;  %v2262_v38 = vld [vmem:[%s4656_s8 + $0x258] sm:$0xff] }
 0x492   : > { %1996 = vmatprep.subr.bf16.mxu0 %v3439_v61  ;;  %v3238_v61 = vpack.c.bf16 %v2257_v60, %v2253_v56  ;;  %v2195_v60 = vld [vmem:[%s4656_s8 + $0x40] sm:$0xff] }
 0x495   : > { %1997 = vmatpush1.bf16.msra.mxu0 %v3437_v27 }
 0x496   : > { %1998 = vmatprep.subr.bf16.mxu0 %v3442_v62  ;;  %v2261_v62 = vld [vmem:[%s4656_s8 + $0x250] sm:$0xff] }
 0x499   : > { %1999 = vmatpush1.bf16.msra.mxu0 %v3440_v28  ;;  %v2265_v28 = vld [vmem:[%s4656_s8 + $0x270] sm:$0xff] }
 0x49a   : > { %2000 = vmatprep.subr.bf16.mxu0 %v3445_v29  ;;  %v2270_v29 = vld [vmem:[%s4656_s8 + $0x298] sm:$0xff] }
 0x49d   : > { %2001 = vmatpush1.bf16.msra.mxu0 %v3443_v30  ;;  %v2274_v30 = vld [vmem:[%s4656_s8 + $0x2b8] sm:$0xff] }
 0x49e   : > { %2002 = vmatprep.subr.bf16.mxu0 %v3448_v32  ;;  %v3242_v32 = vpack.c.bf16 %v2265_v28, %v2261_v62 }
 0x4a1   : > { %2003 = vmatpush1.bf16.msra.mxu0 %v3446_v14  ;;  %v3244_v14 = vpack.c.bf16 %v2274_v30, %v2270_v29  ;;  %v2203_v29 = vld [vmem:[%s4656_s8 + $0x80] sm:$0xff] }
 0x4a2   : > { %3205 = vmatprep.subr.bf16.mxu0 %v3204_v35  ;;  %v2278_v35 = vld [vmem:[%s4656_s8 + $0x2d8] sm:$0xff]  ;;  %v2207_v30 = vld [vmem:[%s4656_s8 + $0xa0] sm:$0xff] }
 0x4a3   : > { %v3150_v34 = vpack.c.bf16 %v2207_v30, %v2203_v29 }
 0x4a4   : > { %2818 = vmatmul.mubr.msk.bf16.vlgmr.msra.gmra.mrb[12].mxu0 %vm3938_vm9, %v2817_v25  ;;  %v2254_v25 = vld [vmem:[%s4656_s8 + $0x218] sm:$0xff] }
 0x4a5   : > { %2030 = vmatprep.mubr.bf16.mxu0 %v3574_v0  ;;  %3207 = vmatpush1.bf16.msra.mxu0 %v3206_v43  ;;  %v3236_v2 = vpack.c.bf16 %v2258_v52, %v2254_v25  ;;  %v2266_v0 = vld [vmem:[%s4656_s8 + $0x278] sm:$0xff]  ;;  %v3248_v43 = vpack.c.bf16 %v2282_v37, %v2278_v35  ;;  %v2196_v25 = vld [vmem:[%s4656_s8 + $0x48] sm:$0xff]  ;;  %v2211_v37 = vld [vmem:[%s4656_s8 + $0xc0] sm:$0xff] }
 0x4a6   : > { %3209 = vmatprep.subr.bf16.mxu0 %v3208_v45  ;;  %v3240_v27 = vpack.c.bf16 %v2266_v0, %v2262_v38  ;;  %v2286_v45 = vld [vmem:[%s4656_s8 + $0x318] sm:$0xff]  ;;  %v2200_v52 = vld [vmem:[%s4656_s8 + $0x68] sm:$0xff]  ;;  %v2199_v38 = vld [vmem:[%s4656_s8 + $0x60] sm:$0xff] }
 0x4a7   : > { %v3144_v56 = vpack.c.bf16 %v2200_v52, %v2196_v25  ;;  %v2204_v0 = vld [vmem:[%s4656_s8 + $0x88] sm:$0xff]  ;;  %v3146_v62 = vpack.c.bf16 %v2199_v38, %v2195_v60 }
 0x4a8   : > { %v2280_v60 = vld [vmem:[%s4656_s8 + $0x2e8] sm:$0xff] }
 0x4a9   : > { %3211 = vmatpush1.bf16.msra.mxu0 %v3210_v48  ;;  %v3252_v48 = vpack.c.bf16 %v2290_v46, %v2286_v45 }
 0x4aa   : > { %3213 = vmatprep.subr.bf16.mxu0 %v3212_v51  ;;  %v2294_v51 = vld [vmem:[%s4656_s8 + $0x358] sm:$0xff] }
 0x4ab   : > { %v3256_v55 = vpack.c.bf16 %v2298_v53, %v2294_v51  ;;  %v2045_v51 = vld [vmem:[%s4655_s7 + $0x20] sm:$0xff] }
 0x4ac   : > { %2821 = vmatmul.mubr.msk.bf16.gmra.mrb[16].mxu0 %vm3938_vm9, %v2820_v31  ;;  %v2246_v31 = vld [vmem:[%s4656_s8 + $0x1d8] sm:$0xff] }
 0x4ad   : > { %3215 = vmatpush1.bf16.msra.mxu0 %v3214_v57  ;;  %v3232_v10 = vpack.c.bf16 %v2250_v26, %v2246_v31  ;;  %v2293_v57 = vld [vmem:[%s4656_s8 + $0x350] sm:$0xff] }
 0x4ae   : > { %3217 = vmatprep.subr.bf16.mxu0 %v3216_v59  ;;  %v2302_v59 = vld [vmem:[%s4656_s8 + $0x398] sm:$0xff]  ;;  %v3258_v3 = vpack.c.bf16 %v2297_v58, %v2293_v57  ;;  %v2231_v57 = vld [vmem:[%s4656_s8 + $0x160] sm:$0xff]  ;;  %v2236_v58 = vld [vmem:[%s4656_s8 + $0x188] sm:$0xff] }
 0x4af   : > { %v3260_v4 = vpack.c.bf16 %v2306_v63, %v2302_v59  ;;  %v2240_v59 = vld [vmem:[%s4656_s8 + $0x1a8] sm:$0xff] }
 0x4b0   : > { %v2046_v63 = vld [vmem:[%s4655_s7 + $0x28] sm:$0xff] }
 0x4b1   : > { %3219 = vmatpush1.bf16.msra.mxu0 %v3218_v8  ;;  %v2305_v8 = vld [vmem:[%s4656_s8 + $0x3b0] sm:$0xff] }
 0x4b2   : > { %3221 = vmatprep.subr.bf16.mxu0 %v3220_v9  ;;  %v2310_v9 = vld [vmem:[%s4656_s8 + $0x3d8] sm:$0xff]  ;;  %v3262_v13 = vpack.c.bf16 %v2305_v8, %v2301_v40  ;;  %v2235_v40 = vld [vmem:[%s4656_s8 + $0x180] sm:$0xff] }
 0x4b3   : > { %v3264_v16 = vpack.c.bf16 %v2314_v12, %v2310_v9  ;;  %v2239_v8 = vld [vmem:[%s4656_s8 + $0x1a0] sm:$0xff]  ;;  %v2244_v9 = vld [vmem:[%s4656_s8 + $0x1c8] sm:$0xff] }
 0x4b4   : > { %v2248_v12 = vld [vmem:[%s4656_s8 + $0x1e8] sm:$0xff] }
 0x4b5   : > { %3223 = vmatpush1.bf16.msra.mxu0 %v3222_v18 }
 0x4b6   : > { %3225 = vmatprep.subr.bf16.mxu0 %v3224_v20 }
 0x4b9   : > { %3227 = vmatpush1.bf16.msra.mxu0 %v3226_v39 }
 0x4ba   : > { %3229 = vmatprep.subr.bf16.mxu0 %v3228_v7  ;;  %v2188_v7 = vld [vmem:[%s4656_s8 + $0x8] sm:$0xff] }
 0x4bd   : > { %3231 = vmatpush1.bf16.msra.mxu0 %v3230_v23 }
 0x4be   : > { %3233 = vmatprep.subr.bf16.mxu0 %v3232_v10  ;;  %v3140_v10 = vpack.c.bf16 %v2192_v19, %v2188_v7  ;;  %v2251_v7 = vld [vmem:[%s4656_s8 + $0x200] sm:$0xff] }
 0x4bf   : > { %v2255_v19 = vld [vmem:[%s4656_s8 + $0x220] sm:$0xff] }
 0x4c1   : > { %3235 = vmatpush1.bf16.msra.mxu0 %v3234_v15  ;;  %v2041_v15 = vld [vmem:[%s4655_s7] sm:$0xff] }
 0x4c2   : > { %3237 = vmatprep.subr.bf16.mxu0 %v3236_v2  ;;  %v3142_v2 = vpack.c.bf16 %v2191_v42, %v2187_v24  ;;  %v2268_v24 = vld [vmem:[%s4656_s8 + $0x288] sm:$0xff] }
 0x4c3   : > { %v2272_v42 = vld [vmem:[%s4656_s8 + $0x2a8] sm:$0xff] }
 0x4c4   : > { %v3180_v52 = vpack.c.bf16 %v2272_v42, %v2268_v24 }
 0x4c5   : > { %3239 = vmatpush1.bf16.msra.mxu0 %v3238_v61  ;;  %v2208_v61 = vld [vmem:[%s4656_s8 + $0xa8] sm:$0xff] }
 0x4c6   : > { %3241 = vmatprep.subr.bf16.mxu0 %v3240_v27  ;;  %v2042_v27 = vld [vmem:[%s4655_s7 + $0x8] sm:$0xff]  ;;  %v3148_v28 = vpack.c.bf16 %v2208_v61, %v2204_v0  ;;  %v2275_v61 = vld [vmem:[%s4656_s8 + $0x2c0] sm:$0xff] }
 0x4c9   : > { %3243 = vmatpush1.bf16.msra.mxu0 %v3242_v32  ;;  %v2212_v32 = vld [vmem:[%s4656_s8 + $0xc8] sm:$0xff] }
 0x4ca   : > { %3245 = vmatprep.subr.bf16.mxu0 %v3244_v14  ;;  %v2216_v14 = vld [vmem:[%s4656_s8 + $0xe8] sm:$0xff] }
 0x4cb   : > { %v3152_v35 = vpack.c.bf16 %v2216_v14, %v2212_v32  ;;  %v2283_v32 = vld [vmem:[%s4656_s8 + $0x300] sm:$0xff] }
 0x4cc   : > { %v2287_v14 = vld [vmem:[%s4656_s8 + $0x320] sm:$0xff] }
 0x4cd   : > { %3247 = vmatpush1.bf16.msra.mxu0 %v3246_v41  ;;  %v2215_v41 = vld [vmem:[%s4656_s8 + $0xe0] sm:$0xff] }
 0x4ce   : > { %3249 = vmatprep.subr.bf16.mxu0 %v3248_v43  ;;  %v2220_v43 = vld [vmem:[%s4656_s8 + $0x108] sm:$0xff]  ;;  %v3154_v45 = vpack.c.bf16 %v2215_v41, %v2211_v37  ;;  %v2291_v41 = vld [vmem:[%s4656_s8 + $0x340] sm:$0xff] }
 0x4cf   : > { %v3156_v46 = vpack.c.bf16 %v2224_v6, %v2220_v43  ;;  %v2295_v43 = vld [vmem:[%s4656_s8 + $0x360] sm:$0xff]  ;;  %v2300_v6 = vld [vmem:[%s4656_s8 + $0x388] sm:$0xff] }
 0x4d1   : > { %3251 = vmatpush1.bf16.msra.mxu0 %v3250_v47  ;;  %v2219_v47 = vld [vmem:[%s4656_s8 + $0x100] sm:$0xff] }
 0x4d2   : > { %3253 = vmatprep.subr.bf16.mxu0 %v3252_v48  ;;  %v2223_v48 = vld [vmem:[%s4656_s8 + $0x120] sm:$0xff] }
 0x4d3   : > { %v3158_v53 = vpack.c.bf16 %v2223_v48, %v2219_v47  ;;  %v2299_v47 = vld [vmem:[%s4656_s8 + $0x380] sm:$0xff] }
 0x4d4   : > { %v2303_v48 = vld [vmem:[%s4656_s8 + $0x3a0] sm:$0xff] }
 0x4d5   : > { %3255 = vmatpush1.bf16.msra.mxu0 %v3254_v54  ;;  %v3160_v54 = vpack.c.bf16 %v2232_v50, %v2228_v49  ;;  %v2308_v49 = vld [vmem:[%s4656_s8 + $0x3c8] sm:$0xff] }
 0x4d6   : > { %3257 = vmatprep.subr.bf16.mxu0 %v3256_v55  ;;  %v2227_v55 = vld [vmem:[%s4656_s8 + $0x140] sm:$0xff]  ;;  %v2312_v50 = vld [vmem:[%s4656_s8 + $0x3e8] sm:$0xff] }
 0x4d9   : > { %3259 = vmatpush1.bf16.msra.mxu0 %v3258_v3  ;;  %v3162_v3 = vpack.c.bf16 %v2231_v57, %v2227_v55  ;;  %v2311_v55 = vld [vmem:[%s4656_s8 + $0x3e0] sm:$0xff]  ;;  %v2309_v57 = vld [vmem:[%s4656_s8 + $0x3d0] sm:$0xff] }
 0x4da   : > { %3261 = vmatprep.subr.bf16.mxu0 %v3260_v4  ;;  %v3164_v4 = vpack.c.bf16 %v2240_v59, %v2236_v58  ;;  %v2313_v59 = vld [vmem:[%s4656_s8 + $0x3f0] sm:$0xff] }
 0x4dd   : > { %3263 = vmatpush1.bf16.msra.mxu0 %v3262_v13  ;;  %v2047_v13 = vld [vmem:[%s4655_s7 + $0x30] sm:$0xff] }
 0x4de   : > { %3265 = vmatprep.subr.bf16.mxu0 %v3264_v16  ;;  %v3166_v16 = vpack.c.bf16 %v2239_v8, %v2235_v40 }
 0x577   : > { %v2022_v17 = vpop.f32.mrb[12].mxu0 }
 0x578   : > { %v2024_v18 = vpop.f32.mrb[13].mxu0 }
 0x579   : > { %v2026_v20 = vpop.f32.mrb[14].mxu0 }
 0x57a   : > { %v3134_v21 = vpack.c.bf16 %v2026_v20, %v2022_v17  ;;  %v2028_v22 = vpop.f32.mrb[15].mxu0  ;;  %v3168_v17 = vpack.c.bf16 %v2248_v12, %v2244_v9  ;;  %v2247_v20 = vld [vmem:[%s4656_s8 + $0x1e0] sm:$0xff] }
 0x57b   : > { %v3132_v5 = vpack.c.bf16 %v2028_v22, %v2024_v18  ;;  %v2243_v18 = vld [vmem:[%s4656_s8 + $0x1c0] sm:$0xff]  ;;  %v2256_v22 = vld [vmem:[%s4656_s8 + $0x228] sm:$0xff] }
 0x57d   : > { %3133 = vmatprep.subr.bf16.mxu1 %v3132_v5  ;;  %v2048_v5 = vld [vmem:[%s4655_s7 + $0x38] sm:$0xff] }
 0x57e   : > { %3135 = vmatpush1.bf16.msra.mxu1 %v3134_v21  ;;  %v2252_v21 = vld [vmem:[%s4656_s8 + $0x208] sm:$0xff] }
 0x57f   : > { %v2032_v36 = vpop.f32.mrb[16].mxu0 }
 0x580   : > { %v2034_v39 = vpop.f32.mrb[17].mxu0 }
 0x581   : > { %v2036_v11 = vpop.f32.mrb[18].mxu0 }
 0x582   : > { %v3138_v31 = vpack.c.bf16 %v2036_v11, %v2032_v36  ;;  %v2038_v26 = vpop.f32.mrb[19].mxu0  ;;  %v3170_v36 = vpack.c.bf16 %v2247_v20, %v2243_v18  ;;  %v2264_v11 = vld [vmem:[%s4656_s8 + $0x268] sm:$0xff] }
 0x583   : > { %v3136_v23 = vpack.c.bf16 %v2038_v26, %v2034_v39  ;;  %v3172_v39 = vpack.c.bf16 %v2256_v22, %v2252_v21 }
 0x585   : > { %3137 = vmatprep.subr.bf16.mxu1 %v3136_v23  ;;  %v2259_v23 = vld [vmem:[%s4656_s8 + $0x240] sm:$0xff] }
 0x586   : > { %3139 = vmatpush1.bf16.msra.mxu1 %v3138_v31  ;;  %v3174_v31 = vpack.c.bf16 %v2255_v19, %v2251_v7 }
 0x587   : > { %3141 = vmatprep.subr.bf16.mxu1 %v3140_v10  ;;  %v2263_v10 = vld [vmem:[%s4656_s8 + $0x260] sm:$0xff] }
 0x588   : > { %v3178_v25 = vpack.c.bf16 %v2263_v10, %v2259_v23 }
 0x589   : > { %2822 = vmatmul.mubr.msk.f32.vlgmr.msra.gmra.mrb[16].mxu1 %vm2049_vm10, %v2041_v15  ;;  %v2267_v15 = vld [vmem:[%s4656_s8 + $0x280] sm:$0xff] }
 0x58a   : > { %2144 = vmatprep.mubr.f32.mxu1 %v3571_v1  ;;  %3143 = vmatpush1.bf16.msra.mxu1 %v3142_v2  ;;  %v2271_v2 = vld [vmem:[%s4656_s8 + $0x2a0] sm:$0xff] }
 0x58b   : > { %3145 = vmatprep.subr.bf16.mxu1 %v3144_v56  ;;  %v2276_v56 = vld [vmem:[%s4656_s8 + $0x2c8] sm:$0xff]  ;;  %v3182_v38 = vpack.c.bf16 %v2271_v2, %v2267_v15 }
 0x58c   : > { %v3184_v0 = vpack.c.bf16 %v2280_v60, %v2276_v56 }
 0x58d   : > { %2823 = vmatmul.mubr.msk.f32.gmra.mrb[18].mxu1 %vm2049_vm10, %v2042_v27  ;;  %v2279_v27 = vld [vmem:[%s4656_s8 + $0x2e0] sm:$0xff] }
 0x58e   : > { %2150 = vmatprep.mubr.f32.mxu1 %v3571_v1  ;;  %3147 = vmatpush1.bf16.msra.mxu1 %v3146_v62  ;;  %v2284_v62 = vld [vmem:[%s4656_s8 + $0x308] sm:$0xff]  ;;  %v3186_v29 = vpack.c.bf16 %v2279_v27, %v2275_v61 }
 0x58f   : > { %3149 = vmatprep.subr.bf16.mxu1 %v3148_v28  ;;  %v2288_v28 = vld [vmem:[%s4656_s8 + $0x328] sm:$0xff] }
 0x590   : > { %v3188_v30 = vpack.c.bf16 %v2288_v28, %v2284_v62 }
 0x591   : > { %2824 = vmatmul.mubr.msk.f32.gmra.mrb[20].mxu1 %vm2049_vm10, %v2043_v33  ;;  %v2292_v33 = vld [vmem:[%s4656_s8 + $0x348] sm:$0xff] }
 0x592   : > { %2156 = vmatprep.mubr.f32.mxu1 %v3571_v1  ;;  %3151 = vmatpush1.bf16.msra.mxu1 %v3150_v34  ;;  %v2296_v34 = vld [vmem:[%s4656_s8 + $0x368] sm:$0xff] }
 0x593   : > { %3153 = vmatprep.subr.bf16.mxu1 %v3152_v35  ;;  %v3190_v35 = vpack.c.bf16 %v2287_v14, %v2283_v32  ;;  %v3192_v37 = vpack.c.bf16 %v2296_v34, %v2292_v33 }
 0x595   : > { %2825 = vmatmul.mubr.msk.f32.gmra.mrb[22].mxu1 %vm2049_vm10, %v2044_v44  ;;  %v2304_v44 = vld [vmem:[%s4656_s8 + $0x3a8] sm:$0xff] }
 0x596   : > { %2162 = vmatprep.mubr.f32.mxu1 %v3571_v1  ;;  %3155 = vmatpush1.bf16.msra.mxu1 %v3154_v45  ;;  %v3194_v45 = vpack.c.bf16 %v2295_v43, %v2291_v41 }
 0x597   : > { %3157 = vmatprep.subr.bf16.mxu1 %v3156_v46  ;;  %v3196_v46 = vpack.c.bf16 %v2304_v44, %v2300_v6 }
 0x599   : > { %2826 = vmatmul.mubr.msk.f32.gmra.mrb[24].mxu1 %vm2049_vm10, %v2045_v51  ;;  %v3198_v51 = vpack.c.bf16 %v2303_v48, %v2299_v47 }
 0x59a   : > { %2168 = vmatprep.mubr.f32.mxu1 %v3571_v1  ;;  %3159 = vmatpush1.bf16.msra.mxu1 %v3158_v53  ;;  %v3200_v53 = vpack.c.bf16 %v2312_v50, %v2308_v49 }
 0x59b   : > { %3161 = vmatprep.subr.bf16.mxu1 %v3160_v54  ;;  %v2307_v54 = vld [vmem:[%s4656_s8 + $0x3c0] sm:$0xff] }
 0x59c   : > { %v3202_v58 = vpack.c.bf16 %v2311_v55, %v2307_v54 }
 0x59d   : > { %2827 = vmatmul.mubr.msk.f32.gmra.mrb[26].mxu1 %vm2049_vm10, %v2046_v63  ;;  %v3266_v63 = vpack.c.bf16 %v2313_v59, %v2309_v57 }
 0x59e   : > { %2174 = vmatprep.mubr.f32.mxu1 %v3571_v1  ;;  %3163 = vmatpush1.bf16.msra.mxu1 %v3162_v3 }
 0x59f   : > { %3165 = vmatprep.subr.bf16.mxu1 %v3164_v4  ;;  %3267 = vmatpush1.bf16.msra.mxu0 %v3266_v63 }
 0x5a1   : > { %2828 = vmatmul.mubr.msk.f32.gmra.mrb[28].mxu1 %vm2049_vm10, %v2047_v13 }
 0x5a2   : > { %2180 = vmatprep.mubr.f32.mxu1 %v3571_v1  ;;  %3167 = vmatpush1.bf16.msra.mxu1 %v3166_v16  ;;  %v2260_v1 = vld [vmem:[%s4656_s8 + $0x248] sm:$0xff] }
 0x5a3   : > { %3169 = vmatprep.subr.bf16.mxu1 %v3168_v17  ;;  %v3176_v26 = vpack.c.bf16 %v2264_v11, %v2260_v1 }
 0x5a5   : > { %2829 = vmatmul.mubr.msk.f32.gmra.mrb[30].mxu1 %vm2049_vm10, %v2048_v5 }
 0x5a6   : > { %3171 = vmatpush1.bf16.msra.mxu1 %v3170_v36 }
 0x5a7   : > { %3173 = vmatprep.subr.bf16.mxu1 %v3172_v39 }
 0x5aa   : > { %3175 = vmatpush1.bf16.msra.mxu1 %v3174_v31 }
 0x5ab   : > { %3177 = vmatprep.subr.bf16.mxu1 %v3176_v26 }
 0x5ae   : > { %3179 = vmatpush1.bf16.msra.mxu1 %v3178_v25 }
 0x5af   : > { %3181 = vmatprep.subr.bf16.mxu1 %v3180_v52 }
 0x5b2   : > { %3183 = vmatpush1.bf16.msra.mxu1 %v3182_v38 }
 0x5b3   : > { %3185 = vmatprep.subr.bf16.mxu1 %v3184_v0 }
 0x5b6   : > { %3187 = vmatpush1.bf16.msra.mxu1 %v3186_v29 }
 0x5b7   : > { %3189 = vmatprep.subr.bf16.mxu1 %v3188_v30 }
 0x5ba   : > { %3191 = vmatpush1.bf16.msra.mxu1 %v3190_v35 }
 0x5bb   : > { %3193 = vmatprep.subr.bf16.mxu1 %v3192_v37 }
 0x5be   : > { %3195 = vmatpush1.bf16.msra.mxu1 %v3194_v45 }
 0x5bf   : > { %3197 = vmatprep.subr.bf16.mxu1 %v3196_v46 }
 0x5c2   : > { %3199 = vmatpush1.bf16.msra.mxu1 %v3198_v51 }
 0x5c3   : > { %3201 = vmatprep.subr.bf16.mxu1 %v3200_v53 }
 0x5c6   : > { %3203 = vmatpush1.bf16.msra.mxu1 %v3202_v58 }
 0x65c   : > { %v2140_v3 = vpop.f32.mrb[16].mxu1 }
 0x65d   : > { %v2142_v4 = vpop.f32.mrb[17].mxu1 }
 0x65e   : > { %2379 = vmatprep.mubr.f32.mxu1 %v2142_v4  ;;  %2492 = vmatprep.mubr.f32.mxu0 %v2142_v4 }
 0x65f   : > { %2380 = vmatmul.mubr.f32.vlgmr.msra.gmra.mrb[32].mxu1 %v2140_v3  ;;  %2493 = vmatmul.mubr.f32.vlgmr.msra.gmra.mrb[20].mxu0 %v2140_v3 }
 0x660   : > { %v2146_v40 = vpop.f32.mrb[18].mxu1 }
 0x661   : > { %v2148_v8 = vpop.f32.mrb[19].mxu1 }
 0x662   : > { %2385 = vmatprep.mubr.f32.mxu1 %v2148_v8  ;;  %2498 = vmatprep.mubr.f32.mxu0 %v2148_v8 }
 0x663   : > { %2386 = vmatmul.mubr.f32.gmra.mrb[34].mxu1 %v2146_v40  ;;  %2499 = vmatmul.mubr.f32.gmra.mrb[22].mxu0 %v2146_v40 }
 0x664   : > { %v2152_v9 = vpop.f32.mrb[20].mxu1 }
 0x665   : > { %v2154_v12 = vpop.f32.mrb[21].mxu1 }
 0x666   : > { %2391 = vmatprep.mubr.f32.mxu1 %v2154_v12  ;;  %2504 = vmatprep.mubr.f32.mxu0 %v2154_v12 }
 0x667   : > { %2392 = vmatmul.mubr.f32.gmra.mrb[36].mxu1 %v2152_v9  ;;  %2505 = vmatmul.mubr.f32.gmra.mrb[24].mxu0 %v2152_v9 }
 0x668   : > { %v2158_v13 = vpop.f32.mrb[22].mxu1 }
 0x669   : > { %v2160_v16 = vpop.f32.mrb[23].mxu1 }
 0x66a   : > { %2397 = vmatprep.mubr.f32.mxu1 %v2160_v16  ;;  %2510 = vmatprep.mubr.f32.mxu0 %v2160_v16 }
 0x66b   : > { %2398 = vmatmul.mubr.f32.gmra.mrb[38].mxu1 %v2158_v13  ;;  %2511 = vmatmul.mubr.f32.gmra.mrb[26].mxu0 %v2158_v13 }
 0x66c   : > { %v2164_v17 = vpop.f32.mrb[24].mxu1 }
 0x66d   : > { %v2166_v18 = vpop.f32.mrb[25].mxu1 }
 0x66e   : > { %2403 = vmatprep.mubr.f32.mxu1 %v2166_v18  ;;  %2516 = vmatprep.mubr.f32.mxu0 %v2166_v18 }
 0x66f   : > { %2404 = vmatmul.mubr.f32.gmra.mrb[40].mxu1 %v2164_v17  ;;  %2517 = vmatmul.mubr.f32.gmra.mrb[28].mxu0 %v2164_v17 }
 0x670   : > { %v2170_v20 = vpop.f32.mrb[26].mxu1 }
 0x671   : > { %v2172_v21 = vpop.f32.mrb[27].mxu1 }
 0x672   : > { %2409 = vmatprep.mubr.f32.mxu1 %v2172_v21  ;;  %2522 = vmatprep.mubr.f32.mxu0 %v2172_v21 }
 0x673   : > { %2410 = vmatmul.mubr.f32.gmra.mrb[42].mxu1 %v2170_v20  ;;  %2523 = vmatmul.mubr.f32.gmra.mrb[30].mxu0 %v2170_v20 }
 0x674   : > { %v2176_v22 = vpop.f32.mrb[28].mxu1 }
 0x675   : > { %v2178_v5 = vpop.f32.mrb[29].mxu1 }
 0x676   : > { %2415 = vmatprep.mubr.f32.mxu1 %v2178_v5  ;;  %2528 = vmatprep.mubr.f32.mxu0 %v2178_v5 }
 0x677   : > { %2416 = vmatmul.mubr.f32.gmra.mrb[44].mxu1 %v2176_v22  ;;  %2529 = vmatmul.mubr.f32.gmra.mrb[32].mxu0 %v2176_v22 }
 0x678   : > { %v2182_v36 = vpop.f32.mrb[30].mxu1 }
 0x679   : > { %v2184_v39 = vpop.f32.mrb[31].mxu1 }
 0x67a   : > { %2421 = vmatprep.mubr.f32.mxu1 %v2184_v39  ;;  %2534 = vmatprep.mubr.f32.mxu0 %v2184_v39 }
 0x67b   : > { %2422 = vmatmul.mubr.f32.gmra.mrb[46].mxu1 %v2182_v36  ;;  %2535 = vmatmul.mubr.f32.gmra.mrb[34].mxu0 %v2182_v36 }
 0x732   : > { %v2381_v7 = vpop.f32.mrb[32].mxu1  ;;  %v2494_v19 = vpop.f32.mrb[20].mxu0 }
 0x733   : > { %2541 = vst [vmem:[%s4611_s27] sm:$0xff] %v2381_v7  ;;  %2543 = vst [vmem:[%s4611_s27 + $0x10] sm:$0xff] %v2494_v19  ;;  %v2383_v1 = vpop.f32.mrb[33].mxu1  ;;  %v2496_v11 = vpop.f32.mrb[21].mxu0 }
 0x734   : > { %2542 = vst [vmem:[%s4611_s27 + $0x8] sm:$0xff] %v2383_v1  ;;  %2544 = vst [vmem:[%s4611_s27 + $0x18] sm:$0xff] %v2496_v11 }
 0x736   : > { %v2387_v31 = vpop.f32.mrb[34].mxu1  ;;  %v2500_v26 = vpop.f32.mrb[22].mxu0 }
 0x737   : > { %2545 = vst [vmem:[%s4611_s27 + $0x20] sm:$0xff] %v2387_v31  ;;  %2547 = vst [vmem:[%s4611_s27 + $0x30] sm:$0xff] %v2500_v26  ;;  %v2389_v23 = vpop.f32.mrb[35].mxu1  ;;  %v2502_v10 = vpop.f32.mrb[23].mxu0 }
 0x738   : > { %2546 = vst [vmem:[%s4611_s27 + $0x28] sm:$0xff] %v2389_v23  ;;  %2548 = vst [vmem:[%s4611_s27 + $0x38] sm:$0xff] %v2502_v10 }
 0x73a   : > { %v2393_v24 = vpop.f32.mrb[36].mxu1  ;;  %v2506_v42 = vpop.f32.mrb[24].mxu0 }
 0x73b   : > { %2549 = vst [vmem:[%s4611_s27 + $0x40] sm:$0xff] %v2393_v24  ;;  %2551 = vst [vmem:[%s4611_s27 + $0x50] sm:$0xff] %v2506_v42  ;;  %v2395_v25 = vpop.f32.mrb[37].mxu1  ;;  %v2508_v52 = vpop.f32.mrb[25].mxu0 }
 0x73c   : > { %2550 = vst [vmem:[%s4611_s27 + $0x48] sm:$0xff] %v2395_v25  ;;  %2552 = vst [vmem:[%s4611_s27 + $0x58] sm:$0xff] %v2508_v52 }
 0x73e   : > { %v2399_v15 = vpop.f32.mrb[38].mxu1  ;;  %v2512_v2 = vpop.f32.mrb[26].mxu0 }
 0x73f   : > { %2553 = vst [vmem:[%s4611_s27 + $0x60] sm:$0xff] %v2399_v15  ;;  %2555 = vst [vmem:[%s4611_s27 + $0x70] sm:$0xff] %v2512_v2  ;;  %v2401_v56 = vpop.f32.mrb[39].mxu1  ;;  %v2514_v60 = vpop.f32.mrb[27].mxu0 }
 0x740   : > { %2554 = vst [vmem:[%s4611_s27 + $0x68] sm:$0xff] %v2401_v56  ;;  %2556 = vst [vmem:[%s4611_s27 + $0x78] sm:$0xff] %v2514_v60 }
 0x742   : > { %v2405_v38 = vpop.f32.mrb[40].mxu1  ;;  %v2518_v0 = vpop.f32.mrb[28].mxu0 }
 0x743   : > { %2557 = vst [vmem:[%s4611_s27 + $0x80] sm:$0xff] %v2405_v38  ;;  %2559 = vst [vmem:[%s4611_s27 + $0x90] sm:$0xff] %v2518_v0  ;;  %v2407_v61 = vpop.f32.mrb[41].mxu1  ;;  %v2520_v27 = vpop.f32.mrb[29].mxu0 }
 0x744   : > { %2558 = vst [vmem:[%s4611_s27 + $0x88] sm:$0xff] %v2407_v61  ;;  %2560 = vst [vmem:[%s4611_s27 + $0x98] sm:$0xff] %v2520_v27 }
 0x746   : > { %v2411_v62 = vpop.f32.mrb[42].mxu1  ;;  %v2524_v28 = vpop.f32.mrb[30].mxu0 }
 0x747   : > { %2561 = vst [vmem:[%s4611_s27 + $0xa0] sm:$0xff] %v2411_v62  ;;  %2563 = vst [vmem:[%s4611_s27 + $0xb0] sm:$0xff] %v2524_v28  ;;  %v2413_v29 = vpop.f32.mrb[43].mxu1  ;;  %v2526_v30 = vpop.f32.mrb[31].mxu0 }
 0x748   : > { %2562 = vst [vmem:[%s4611_s27 + $0xa8] sm:$0xff] %v2413_v29  ;;  %2564 = vst [vmem:[%s4611_s27 + $0xb8] sm:$0xff] %v2526_v30 }
 0x74a   : > { %v2417_v32 = vpop.f32.mrb[44].mxu1  ;;  %v2530_v14 = vpop.f32.mrb[32].mxu0 }
 0x74b   : > { %2565 = vst [vmem:[%s4611_s27 + $0xc0] sm:$0xff] %v2417_v32  ;;  %2567 = vst [vmem:[%s4611_s27 + $0xd0] sm:$0xff] %v2530_v14  ;;  %v2419_v33 = vpop.f32.mrb[45].mxu1  ;;  %v2532_v34 = vpop.f32.mrb[33].mxu0 }
 0x74c   : > { %2566 = vst [vmem:[%s4611_s27 + $0xc8] sm:$0xff] %v2419_v33  ;;  %2568 = vst [vmem:[%s4611_s27 + $0xd8] sm:$0xff] %v2532_v34 }
 0x74e   : > { %v2423_v35 = vpop.f32.mrb[46].mxu1  ;;  %v2536_v37 = vpop.f32.mrb[34].mxu0 }
 0x74f   : > { %2569 = vst [vmem:[%s4611_s27 + $0xe0] sm:$0xff] %v2423_v35  ;;  %2571 = vst [vmem:[%s4611_s27 + $0xf0] sm:$0xff] %v2536_v37  ;;  %v2425_v41 = vpop.f32.mrb[47].mxu1  ;;  %v2538_v43 = vpop.f32.mrb[35].mxu0 }
 0x750   : > { %2570 = vst [vmem:[%s4611_s27 + $0xe8] sm:$0xff] %v2425_v41  ;;  %2572 = vst [vmem:[%s4611_s27 + $0xf8] sm:$0xff] %v2538_v43 }
 0x751 PF: > { %s21_s30 = sadd.s32 1, %s3563_s30  }
 0x752   : > { %p18_p7 = scmp.ge.s32.totalorder %s21_s30, 4  }
 0x754   :  { %20 = sbr.rel (!%p18_p7) target bundleno = 2 (0x2), region = 95 }
 0x75b   :  { %2597 = vsyncpa [#allocation3], 1 }
 0x75c   :  { %2599 = vsyncpa [#allocation3 + $0x1], 1 }
 0x75d   :  { %2600 = vsyncpa [#allocation5], 1 }

</bundles_post_ra>
